<compile_context>
chip_gen: v5e
topology: v5e:2x2
jax: 0.10.0
libtpu: 0.0.40
codegen_flags: <defaults>
</compile_context>

<pallas_src>
import functools

import jax
import jax.numpy as jnp
from jax.experimental import pallas as pl
from jax.experimental.pallas import tpu as pltpu


# ----------------------------------------------------------------------------
# Fused Pallas kernel: all LSTM layers + FC, single invocation (grid = ()).
# ----------------------------------------------------------------------------
def _lstmnet_kernel(*refs, num_layers, T, Bp, H):
    """refs layout:
         inputs : x_ref (T*Bp, I0) bf16,
                  per layer l: wih_l (I_l, 4H) bf16, whh_l (H, 4H) bf16,
                               b_l (1, 4H) f32,
                  fc_w (H, Op) bf16, fc_b (1, Op) f32
         outputs: out_ref (T*Bp, Op) f32
         scratch: xp  (T*Bp, 4H) f32  -- hoisted input projection (+bias), packed gates
                  act (T*Bp, H)  bf16 -- current layer's output (next layer's input)
    """
    n_in = 1 + 3 * num_layers + 2
    x_ref = refs[0]
    fcw_ref = refs[n_in - 2]
    fcb_ref = refs[n_in - 1]
    out_ref = refs[n_in]
    xp_ref = refs[n_in + 1]
    act_ref = refs[n_in + 2]

    unroll = min(T, 8)                                      # bounded unroll
    inp = x_ref[...]                                        # (T*Bp, I0) bf16
    for layer in range(num_layers):
        wih_ref = refs[1 + 3 * layer]                       # (I_l, 4H) bf16
        whh_ref = refs[2 + 3 * layer]                       # (H, 4H)   bf16
        b_ref = refs[3 + 3 * layer]                         # (1, 4H)   f32

        # ---- hoisted input projection: ONE packed-gate matmul for all
        # timesteps; bias folded in so the recurrence has no per-step broadcast.
        xp_ref[...] = (jnp.dot(inp, wih_ref[...],
                               preferred_element_type=jnp.float32)
                       + b_ref[...])                        # (T*Bp, 4H) f32

        # ---- recurrent weights loaded once, outside the timestep loop.
        w_hh = whh_ref[...]                                 # (H, 4H) bf16

        def step(t, carry, w_hh=w_hh):
            h, c = carry                                    # f32 (Bp, H)
            base = pl.multiple_of(t * Bp, Bp)               # Bp is a multiple of 8
            rows = pl.ds(base, Bp)
            # ONE recurrent matmul per step: bf16 operands, f32 accumulation.
            pre = xp_ref[rows, :] + jnp.dot(
                h.astype(jnp.bfloat16), w_hh,
                preferred_element_type=jnp.float32)         # (Bp, 4H) f32
            i_g = jax.nn.sigmoid(pre[:, 0 * H:1 * H])
            f_g = jax.nn.sigmoid(pre[:, 1 * H:2 * H])
            g_g = jnp.tanh(pre[:, 2 * H:3 * H])
            o_g = jax.nn.sigmoid(pre[:, 3 * H:4 * H])
            c_new = f_g * c + i_g * g_g                     # f32 VPU
            h_new = o_g * jnp.tanh(c_new)
            act_ref[rows, :] = h_new.astype(act_ref.dtype)
            return h_new, c_new

        h0 = jnp.zeros((Bp, H), jnp.float32)
        c0 = jnp.zeros((Bp, H), jnp.float32)
        jax.lax.fori_loop(0, T, step, (h0, c0), unroll=unroll)

        inp = act_ref[...]                                  # bf16, next layer input

    # ---- fused FC epilogue over all timesteps at once. Op is a multiple of
    # 128, so this store is lane-dense (unmasked vst).
    out_ref[...] = (jnp.dot(inp, fcw_ref[...],
                            preferred_element_type=jnp.float32)
                    + fcb_ref[...])


# ----------------------------------------------------------------------------
# Wrapper
# ----------------------------------------------------------------------------
def lstmnet_forward(x_bti, params):
    """x_bti: [B, T, input_size] f32  ->  [B, T, output_size] f32."""
    B, T, I = x_bti.shape
    num_layers = len(params["lstm"])
    H = params["lstm"][0][1].shape[0]        # whh_p is (H, 4H)
    O = params["fc_w_t"].shape[-1]
    Bp = ((B + 7) // 8) * 8                  # pad batch to the f32 sublane tile
    Op = ((O + 127) // 128) * 128            # pad FC output to full 128 lanes

    # Time-major, batch-padded, flattened rows: every timestep occupies an
    # aligned group of Bp (multiple-of-8) rows; matmul operands in bf16.
    x_tbi = jnp.transpose(x_bti, (1, 0, 2)).astype(jnp.bfloat16)
    x_pad = jnp.zeros((T, Bp, I), jnp.bfloat16).at[:, :B].set(x_tbi)
    x2d = x_pad.reshape(T * Bp, I)

    flat_inputs = [x2d]
    for wih_p, whh_p, b_p in params["lstm"]:
        flat_inputs += [wih_p.astype(jnp.bfloat16),
                        whh_p.astype(jnp.bfloat16),
                        b_p.astype(jnp.float32)]
    fcw_pad = jnp.zeros((H, Op), jnp.bfloat16).at[:, :O].set(
        params["fc_w_t"].astype(jnp.bfloat16))
    fcb_pad = jnp.zeros((1, Op), jnp.float32).at[:, :O].set(params["fc_b"])
    flat_inputs += [fcw_pad, fcb_pad]
    n_in = len(flat_inputs)

    kernel = functools.partial(_lstmnet_kernel, num_layers=num_layers,
                               T=T, Bp=Bp, H=H)

    # Device-capacity-aware VMEM budget (v7x has only 64 MiB per TensorCore).
    try:
        vmem_cap = int(pltpu.get_tpu_info().vmem_capacity_bytes)
    except Exception:
        vmem_cap = 64 * 1024 * 1024          # conservative fallback
    io_bytes = sum(int(a.size) * a.dtype.itemsize for a in flat_inputs)
    io_bytes += T * Bp * Op * 4                              # output
    scratch_bytes = T * Bp * 4 * H * 4 + T * Bp * H * 2      # xp (f32) + act (bf16)
    vmem_limit = int(min(int(0.75 * vmem_cap),
                         max(16 * 1024 * 1024, 2 * (io_bytes + scratch_bytes))))

    y2d = pl.pallas_call(
        kernel,
        out_shape=jax.ShapeDtypeStruct((T * Bp, Op), jnp.float32),
        in_specs=[pl.BlockSpec(memory_space=pltpu.MemorySpace.VMEM)] * n_in,
        out_specs=pl.BlockSpec(memory_space=pltpu.MemorySpace.VMEM),
        scratch_shapes=[pltpu.VMEM((T * Bp, 4 * H), jnp.float32),
                        pltpu.VMEM((T * Bp, H), jnp.bfloat16)],
        compiler_params=pltpu.CompilerParams(vmem_limit_bytes=vmem_limit),
    )(*flat_inputs)

    y = y2d.reshape(T, Bp, Op)[:, :B, :O]
    return jnp.transpose(y, (1, 0, 2))       # (B, T, O)


# ----------------------------------------------------------------------------
# Deterministic parameter construction (PyTorch-style uniform(-k, k), k=1/sqrt(H)),
# stored in packed-gate, matmul-ready layouts: (in, 4H), (H, 4H), (1, 4H).
# PyTorch stacks the i,f,g,o gates along the rows of w_ih/w_hh, so a plain
# transpose yields the lane-packed-by-gate column layout.
# ----------------------------------------------------------------------------
def init_params(key, input_size, hidden_size, num_layers, output_size):
    H = hidden_size
    k = 1.0 / jnp.sqrt(jnp.float32(H))
    lstm_params = []
    for layer in range(num_layers):
        in_sz = input_size if layer == 0 else H
        key, k1, k2, k3, k4 = jax.random.split(key, 5)
        w_ih = jax.random.uniform(k1, (4 * H, in_sz), jnp.float32, -k, k)
        w_hh = jax.random.uniform(k2, (4 * H, H), jnp.float32, -k, k)
        b_ih = jax.random.uniform(k3, (4 * H,), jnp.float32, -k, k)
        b_hh = jax.random.uniform(k4, (4 * H,), jnp.float32, -k, k)
        wih_p = w_ih.T                                       # (in, 4H)
        whh_p = w_hh.T                                       # (H, 4H)
        b_p = (b_ih + b_hh).reshape(1, 4 * H)                # (1, 4H)
        lstm_params.append((wih_p, whh_p, b_p))
    key, k5, k6 = jax.random.split(key, 3)
    fc_w = jax.random.uniform(k5, (output_size, H), jnp.float32, -k, k)
    fc_b = jax.random.uniform(k6, (output_size,), jnp.float32, -k, k)
    return {"lstm": lstm_params, "fc_w_t": fc_w.T, "fc_b": fc_b.reshape(1, -1)}


# ----------------------------------------------------------------------------
# Pure-JAX f32 reference (mirrors torch.nn.LSTM(batch_first=True) + Linear).
# ----------------------------------------------------------------------------
def reference_forward(x_bti, params):
    x = x_bti
    B, T, _ = x.shape
    for wih_p, whh_p, b_p in params["lstm"]:
        H = whh_p.shape[0]
        h = jnp.zeros((B, H), jnp.float32)
        c = jnp.zeros((B, H), jnp.float32)
        outs = []
        for t in range(T):
            pre = x[:, t, :] @ wih_p + b_p + h @ whh_p       # (B, 4H)
            i = jax.nn.sigmoid(pre[:, 0 * H:1 * H])
            f = jax.nn.sigmoid(pre[:, 1 * H:2 * H])
            g = jnp.tanh(pre[:, 2 * H:3 * H])
            o = jax.nn.sigmoid(pre[:, 3 * H:4 * H])
            c = f * c + i * g
            h = o * jnp.tanh(c)
            outs.append(h)
        x = jnp.stack(outs, axis=1)
    return x @ params["fc_w_t"] + params["fc_b"]


# ----------------------------------------------------------------------------
if __name__ == "__main__":
    INPUT_SIZE, HIDDEN, NUM_LAYERS, OUTPUT_SIZE = 16, 32, 2, 1
    B, T = 2, 8

    key = jax.random.PRNGKey(0)
    key, pkey, xkey = jax.random.split(key, 3)
    params = init_params(pkey, INPUT_SIZE, HIDDEN, NUM_LAYERS, OUTPUT_SIZE)
    x = jax.random.normal(xkey, (B, T, INPUT_SIZE), jnp.float32)

    fwd = jax.jit(lstmnet_forward)
    out = jax.block_until_ready(fwd(x, params))
    assert out.shape == (B, T, OUTPUT_SIZE), out.shape

    # f32 reference; tolerance accounts for bf16 MXU operands in the kernel
    # (f32 accumulation + f32 gate arithmetic keep the drift well below this).
    ref = jax.block_until_ready(reference_forward(x, params))
    assert jnp.allclose(out, ref, atol=5e-2, rtol=5e-2), float(
        jnp.max(jnp.abs(out - ref)))

    print("KERNEL_OK")
</pallas_src>

<mosaic_0001>
module attributes {stable_mosaic.version = 11 : i64} {
  func.func @_lstmnet_kernel(%arg0: memref<64x16xbf16, #tpu.memory_space<vmem>>, %arg1: memref<16x128xbf16, #tpu.memory_space<vmem>>, %arg2: memref<32x128xbf16, #tpu.memory_space<vmem>>, %arg3: memref<1x128xf32, #tpu.memory_space<vmem>>, %arg4: memref<32x128xbf16, #tpu.memory_space<vmem>>, %arg5: memref<32x128xbf16, #tpu.memory_space<vmem>>, %arg6: memref<1x128xf32, #tpu.memory_space<vmem>>, %arg7: memref<32x128xbf16, #tpu.memory_space<vmem>>, %arg8: memref<1x128xf32, #tpu.memory_space<vmem>>, %arg9: memref<64x128xf32, #tpu.memory_space<vmem>>, %arg10: memref<64x128xf32, #tpu.memory_space<vmem>>, %arg11: memref<64x32xbf16, #tpu.memory_space<vmem>>) attributes {dimension_semantics = [], scalar_prefetch = 0 : i64, scratch_operands = 2 : i64, tpu.core_type = #tpu.core_type<tc>} {
    %c0 = arith.constant 0 : index
    %c0_0 = arith.constant 0 : index
    %0 = vector.load %arg0[%c0, %c0_0] : memref<64x16xbf16, #tpu.memory_space<vmem>>, vector<64x16xbf16>
    %c0_1 = arith.constant 0 : index
    %c0_2 = arith.constant 0 : index
    %1 = vector.load %arg1[%c0_1, %c0_2] : memref<16x128xbf16, #tpu.memory_space<vmem>>, vector<16x128xbf16>
    %cst = arith.constant dense<0.000000e+00> : vector<64x128xf32>
    %2 = tpu.matmul %0, %1, %cst {dimension_numbers = #tpu.dot_dimension_numbers<[1], [0], [0], [1], [0, 0, 1, 1], [], []>} : vector<64x16xbf16>, vector<16x128xbf16>, vector<64x128xf32> -> vector<64x128xf32>
    %c0_3 = arith.constant 0 : index
    %c0_4 = arith.constant 0 : index
    %3 = vector.load %arg3[%c0_3, %c0_4] : memref<1x128xf32, #tpu.memory_space<vmem>>, vector<1x128xf32>
    %4 = vector.broadcast %3 : vector<1x128xf32> to vector<64x128xf32>
    %5 = arith.addf %2, %4 : vector<64x128xf32>
    %c0_5 = arith.constant 0 : index
    %c0_6 = arith.constant 0 : index
    %6 = vector.load %arg10[%c0_5, %c0_6] : memref<64x128xf32, #tpu.memory_space<vmem>>, vector<64x128xf32>
    tpu.vector_store %arg10[%c0_5, %c0_6], %5 {strides = array<i32>} : memref<64x128xf32, #tpu.memory_space<vmem>>, vector<64x128xf32>,
    %c0_7 = arith.constant 0 : index
    %c0_8 = arith.constant 0 : index
    %7 = vector.load %arg2[%c0_7, %c0_8] : memref<32x128xbf16, #tpu.memory_space<vmem>>, vector<32x128xbf16>
    %cst_9 = arith.constant 0.000000e+00 : f32
    %8 = vector.broadcast %cst_9 : f32 to vector<8x32xf32>
    %cst_10 = arith.constant 0.000000e+00 : f32
    %9 = vector.broadcast %cst_10 : f32 to vector<8x32xf32>
    %c0_i32 = arith.constant 0 : i32
    %c8_i32 = arith.constant 8 : i32
    %10 = arith.muli %c0_i32, %c8_i32 : i32
    %11 = tpu.assume_multiple %10, 8 : i32
    %12 = arith.index_cast %11 : i32 to index
    %c0_11 = arith.constant 0 : index
    %13 = vector.load %arg10[%12, %c0_11] : memref<64x128xf32, #tpu.memory_space<vmem>>, vector<8x128xf32>
    %14 = arith.truncf %8 : vector<8x32xf32> to vector<8x32xbf16>
    %cst_12 = arith.constant dense<0.000000e+00> : vector<8x128xf32>
    %15 = tpu.matmul %14, %7, %cst_12 {dimension_numbers = #tpu.dot_dimension_numbers<[1], [0], [0], [1], [0, 0, 1, 1], [], []>} : vector<8x32xbf16>, vector<32x128xbf16>, vector<8x128xf32> -> vector<8x128xf32>
    %16 = arith.addf %13, %15 : vector<8x128xf32>
    %17 = vector.extract_strided_slice %16 {offsets = [0, 0], sizes = [8, 32], strides = [1, 1]} : vector<8x128xf32> to vector<8x32xf32>
    %18 = arith.negf %17 : vector<8x32xf32>
    %19 = math.exp %18 : vector<8x32xf32>
    %cst_13 = arith.constant 1.000000e+00 : f32
    %20 = vector.broadcast %cst_13 : f32 to vector<8x32xf32>
    %21 = arith.addf %20, %19 : vector<8x32xf32>
    %22 = arith.divf %20, %21 : vector<8x32xf32>
    %23 = vector.extract_strided_slice %16 {offsets = [0, 32], sizes = [8, 32], strides = [1, 1]} : vector<8x128xf32> to vector<8x32xf32>
    %24 = arith.negf %23 : vector<8x32xf32>
    %25 = math.exp %24 : vector<8x32xf32>
    %cst_14 = arith.constant 1.000000e+00 : f32
    %26 = vector.broadcast %cst_14 : f32 to vector<8x32xf32>
    %27 = arith.addf %26, %25 : vector<8x32xf32>
    %28 = arith.divf %26, %27 : vector<8x32xf32>
    %29 = vector.extract_strided_slice %16 {offsets = [0, 64], sizes = [8, 32], strides = [1, 1]} : vector<8x128xf32> to vector<8x32xf32>
    %30 = math.tanh %29 : vector<8x32xf32>
    %31 = vector.extract_strided_slice %16 {offsets = [0, 96], sizes = [8, 32], strides = [1, 1]} : vector<8x128xf32> to vector<8x32xf32>
    %32 = arith.negf %31 : vector<8x32xf32>
    %33 = math.exp %32 : vector<8x32xf32>
    %cst_15 = arith.constant 1.000000e+00 : f32
    %34 = vector.broadcast %cst_15 : f32 to vector<8x32xf32>
    %35 = arith.addf %34, %33 : vector<8x32xf32>
    %36 = arith.divf %34, %35 : vector<8x32xf32>
    %37 = arith.mulf %28, %9 : vector<8x32xf32>
    %38 = arith.mulf %22, %30 : vector<8x32xf32>
    %39 = arith.addf %37, %38 : vector<8x32xf32>
    %40 = math.tanh %39 : vector<8x32xf32>
    %41 = arith.mulf %36, %40 : vector<8x32xf32>
    %42 = arith.truncf %41 : vector<8x32xf32> to vector<8x32xbf16>
    %43 = arith.index_cast %11 : i32 to index
    %c0_16 = arith.constant 0 : index
    %44 = vector.load %arg11[%43, %c0_16] : memref<64x32xbf16, #tpu.memory_space<vmem>>, vector<8x32xbf16>
    tpu.vector_store %arg11[%43, %c0_16], %42 {strides = array<i32>} : memref<64x32xbf16, #tpu.memory_space<vmem>>, vector<8x32xbf16>,
    %c1_i32 = arith.constant 1 : i32
    %c8_i32_17 = arith.constant 8 : i32
    %45 = arith.muli %c1_i32, %c8_i32_17 : i32
    %46 = tpu.assume_multiple %45, 8 : i32
    %47 = arith.index_cast %46 : i32 to index
    %c0_18 = arith.constant 0 : index
    %48 = vector.load %arg10[%47, %c0_18] : memref<64x128xf32, #tpu.memory_space<vmem>>, vector<8x128xf32>
    %49 = arith.truncf %41 : vector<8x32xf32> to vector<8x32xbf16>
    %cst_19 = arith.constant dense<0.000000e+00> : vector<8x128xf32>
    %50 = tpu.matmul %49, %7, %cst_19 {dimension_numbers = #tpu.dot_dimension_numbers<[1], [0], [0], [1], [0, 0, 1, 1], [], []>} : vector<8x32xbf16>, vector<32x128xbf16>, vector<8x128xf32> -> vector<8x128xf32>
    %51 = arith.addf %48, %50 : vector<8x128xf32>
    %52 = vector.extract_strided_slice %51 {offsets = [0, 0], sizes = [8, 32], strides = [1, 1]} : vector<8x128xf32> to vector<8x32xf32>
    %53 = arith.negf %52 : vector<8x32xf32>
    %54 = math.exp %53 : vector<8x32xf32>
    %cst_20 = arith.constant 1.000000e+00 : f32
    %55 = vector.broadcast %cst_20 : f32 to vector<8x32xf32>
    %56 = arith.addf %55, %54 : vector<8x32xf32>
    %57 = arith.divf %55, %56 : vector<8x32xf32>
    %58 = vector.extract_strided_slice %51 {offsets = [0, 32], sizes = [8, 32], strides = [1, 1]} : vector<8x128xf32> to vector<8x32xf32>
    %59 = arith.negf %58 : vector<8x32xf32>
    %60 = math.exp %59 : vector<8x32xf32>
    %cst_21 = arith.constant 1.000000e+00 : f32
    %61 = vector.broadcast %cst_21 : f32 to vector<8x32xf32>
    %62 = arith.addf %61, %60 : vector<8x32xf32>
    %63 = arith.divf %61, %62 : vector<8x32xf32>
    %64 = vector.extract_strided_slice %51 {offsets = [0, 64], sizes = [8, 32], strides = [1, 1]} : vector<8x128xf32> to vector<8x32xf32>
    %65 = math.tanh %64 : vector<8x32xf32>
    %66 = vector.extract_strided_slice %51 {offsets = [0, 96], sizes = [8, 32], strides = [1, 1]} : vector<8x128xf32> to vector<8x32xf32>
    %67 = arith.negf %66 : vector<8x32xf32>
    %68 = math.exp %67 : vector<8x32xf32>
    %cst_22 = arith.constant 1.000000e+00 : f32
    %69 = vector.broadcast %cst_22 : f32 to vector<8x32xf32>
    %70 = arith.addf %69, %68 : vector<8x32xf32>
    %71 = arith.divf %69, %70 : vector<8x32xf32>
    %72 = arith.mulf %63, %39 : vector<8x32xf32>
    %73 = arith.mulf %57, %65 : vector<8x32xf32>
    %74 = arith.addf %72, %73 : vector<8x32xf32>
    %75 = math.tanh %74 : vector<8x32xf32>
    %76 = arith.mulf %71, %75 : vector<8x32xf32>
    %77 = arith.truncf %76 : vector<8x32xf32> to vector<8x32xbf16>
    %78 = arith.index_cast %46 : i32 to index
    %c0_23 = arith.constant 0 : index
    %79 = vector.load %arg11[%78, %c0_23] : memref<64x32xbf16, #tpu.memory_space<vmem>>, vector<8x32xbf16>
    tpu.vector_store %arg11[%78, %c0_23], %77 {strides = array<i32>} : memref<64x32xbf16, #tpu.memory_space<vmem>>, vector<8x32xbf16>,
    %c2_i32 = arith.constant 2 : i32
    %c8_i32_24 = arith.constant 8 : i32
    %80 = arith.muli %c2_i32, %c8_i32_24 : i32
    %81 = tpu.assume_multiple %80, 8 : i32
    %82 = arith.index_cast %81 : i32 to index
    %c0_25 = arith.constant 0 : index
    %83 = vector.load %arg10[%82, %c0_25] : memref<64x128xf32, #tpu.memory_space<vmem>>, vector<8x128xf32>
    %84 = arith.truncf %76 : vector<8x32xf32> to vector<8x32xbf16>
    %cst_26 = arith.constant dense<0.000000e+00> : vector<8x128xf32>
    %85 = tpu.matmul %84, %7, %cst_26 {dimension_numbers = #tpu.dot_dimension_numbers<[1], [0], [0], [1], [0, 0, 1, 1], [], []>} : vector<8x32xbf16>, vector<32x128xbf16>, vector<8x128xf32> -> vector<8x128xf32>
    %86 = arith.addf %83, %85 : vector<8x128xf32>
    %87 = vector.extract_strided_slice %86 {offsets = [0, 0], sizes = [8, 32], strides = [1, 1]} : vector<8x128xf32> to vector<8x32xf32>
    %88 = arith.negf %87 : vector<8x32xf32>
    %89 = math.exp %88 : vector<8x32xf32>
    %cst_27 = arith.constant 1.000000e+00 : f32
    %90 = vector.broadcast %cst_27 : f32 to vector<8x32xf32>
    %91 = arith.addf %90, %89 : vector<8x32xf32>
    %92 = arith.divf %90, %91 : vector<8x32xf32>
    %93 = vector.extract_strided_slice %86 {offsets = [0, 32], sizes = [8, 32], strides = [1, 1]} : vector<8x128xf32> to vector<8x32xf32>
    %94 = arith.negf %93 : vector<8x32xf32>
    %95 = math.exp %94 : vector<8x32xf32>
    %cst_28 = arith.constant 1.000000e+00 : f32
    %96 = vector.broadcast %cst_28 : f32 to vector<8x32xf32>
    %97 = arith.addf %96, %95 : vector<8x32xf32>
    %98 = arith.divf %96, %97 : vector<8x32xf32>
    %99 = vector.extract_strided_slice %86 {offsets = [0, 64], sizes = [8, 32], strides = [1, 1]} : vector<8x128xf32> to vector<8x32xf32>
    %100 = math.tanh %99 : vector<8x32xf32>
    %101 = vector.extract_strided_slice %86 {offsets = [0, 96], sizes = [8, 32], strides = [1, 1]} : vector<8x128xf32> to vector<8x32xf32>
    %102 = arith.negf %101 : vector<8x32xf32>
    %103 = math.exp %102 : vector<8x32xf32>
    %cst_29 = arith.constant 1.000000e+00 : f32
    %104 = vector.broadcast %cst_29 : f32 to vector<8x32xf32>
    %105 = arith.addf %104, %103 : vector<8x32xf32>
    %106 = arith.divf %104, %105 : vector<8x32xf32>
    %107 = arith.mulf %98, %74 : vector<8x32xf32>
    %108 = arith.mulf %92, %100 : vector<8x32xf32>
    %109 = arith.addf %107, %108 : vector<8x32xf32>
    %110 = math.tanh %109 : vector<8x32xf32>
    %111 = arith.mulf %106, %110 : vector<8x32xf32>
    %112 = arith.truncf %111 : vector<8x32xf32> to vector<8x32xbf16>
    %113 = arith.index_cast %81 : i32 to index
    %c0_30 = arith.constant 0 : index
    %114 = vector.load %arg11[%113, %c0_30] : memref<64x32xbf16, #tpu.memory_space<vmem>>, vector<8x32xbf16>
    tpu.vector_store %arg11[%113, %c0_30], %112 {strides = array<i32>} : memref<64x32xbf16, #tpu.memory_space<vmem>>, vector<8x32xbf16>,
    %c3_i32 = arith.constant 3 : i32
    %c8_i32_31 = arith.constant 8 : i32
    %115 = arith.muli %c3_i32, %c8_i32_31 : i32
    %116 = tpu.assume_multiple %115, 8 : i32
    %117 = arith.index_cast %116 : i32 to index
    %c0_32 = arith.constant 0 : index
    %118 = vector.load %arg10[%117, %c0_32] : memref<64x128xf32, #tpu.memory_space<vmem>>, vector<8x128xf32>
    %119 = arith.truncf %111 : vector<8x32xf32> to vector<8x32xbf16>
    %cst_33 = arith.constant dense<0.000000e+00> : vector<8x128xf32>
    %120 = tpu.matmul %119, %7, %cst_33 {dimension_numbers = #tpu.dot_dimension_numbers<[1], [0], [0], [1], [0, 0, 1, 1], [], []>} : vector<8x32xbf16>, vector<32x128xbf16>, vector<8x128xf32> -> vector<8x128xf32>
    %121 = arith.addf %118, %120 : vector<8x128xf32>
    %122 = vector.extract_strided_slice %121 {offsets = [0, 0], sizes = [8, 32], strides = [1, 1]} : vector<8x128xf32> to vector<8x32xf32>
    %123 = arith.negf %122 : vector<8x32xf32>
    %124 = math.exp %123 : vector<8x32xf32>
    %cst_34 = arith.constant 1.000000e+00 : f32
    %125 = vector.broadcast %cst_34 : f32 to vector<8x32xf32>
    %126 = arith.addf %125, %124 : vector<8x32xf32>
    %127 = arith.divf %125, %126 : vector<8x32xf32>
    %128 = vector.extract_strided_slice %121 {offsets = [0, 32], sizes = [8, 32], strides = [1, 1]} : vector<8x128xf32> to vector<8x32xf32>
    %129 = arith.negf %128 : vector<8x32xf32>
    %130 = math.exp %129 : vector<8x32xf32>
    %cst_35 = arith.constant 1.000000e+00 : f32
    %131 = vector.broadcast %cst_35 : f32 to vector<8x32xf32>
    %132 = arith.addf %131, %130 : vector<8x32xf32>
    %133 = arith.divf %131, %132 : vector<8x32xf32>
    %134 = vector.extract_strided_slice %121 {offsets = [0, 64], sizes = [8, 32], strides = [1, 1]} : vector<8x128xf32> to vector<8x32xf32>
    %135 = math.tanh %134 : vector<8x32xf32>
    %136 = vector.extract_strided_slice %121 {offsets = [0, 96], sizes = [8, 32], strides = [1, 1]} : vector<8x128xf32> to vector<8x32xf32>
    %137 = arith.negf %136 : vector<8x32xf32>
    %138 = math.exp %137 : vector<8x32xf32>
    %cst_36 = arith.constant 1.000000e+00 : f32
    %139 = vector.broadcast %cst_36 : f32 to vector<8x32xf32>
    %140 = arith.addf %139, %138 : vector<8x32xf32>
    %141 = arith.divf %139, %140 : vector<8x32xf32>
    %142 = arith.mulf %133, %109 : vector<8x32xf32>
    %143 = arith.mulf %127, %135 : vector<8x32xf32>
    %144 = arith.addf %142, %143 : vector<8x32xf32>
    %145 = math.tanh %144 : vector<8x32xf32>
    %146 = arith.mulf %141, %145 : vector<8x32xf32>
    %147 = arith.truncf %146 : vector<8x32xf32> to vector<8x32xbf16>
    %148 = arith.index_cast %116 : i32 to index
    %c0_37 = arith.constant 0 : index
    %149 = vector.load %arg11[%148, %c0_37] : memref<64x32xbf16, #tpu.memory_space<vmem>>, vector<8x32xbf16>
    tpu.vector_store %arg11[%148, %c0_37], %147 {strides = array<i32>} : memref<64x32xbf16, #tpu.memory_space<vmem>>, vector<8x32xbf16>,
    %c4_i32 = arith.constant 4 : i32
    %c8_i32_38 = arith.constant 8 : i32
    %150 = arith.muli %c4_i32, %c8_i32_38 : i32
    %151 = tpu.assume_multiple %150, 8 : i32
    %152 = arith.index_cast %151 : i32 to index
    %c0_39 = arith.constant 0 : index
    %153 = vector.load %arg10[%152, %c0_39] : memref<64x128xf32, #tpu.memory_space<vmem>>, vector<8x128xf32>
    %154 = arith.truncf %146 : vector<8x32xf32> to vector<8x32xbf16>
    %cst_40 = arith.constant dense<0.000000e+00> : vector<8x128xf32>
    %155 = tpu.matmul %154, %7, %cst_40 {dimension_numbers = #tpu.dot_dimension_numbers<[1], [0], [0], [1], [0, 0, 1, 1], [], []>} : vector<8x32xbf16>, vector<32x128xbf16>, vector<8x128xf32> -> vector<8x128xf32>
    %156 = arith.addf %153, %155 : vector<8x128xf32>
    %157 = vector.extract_strided_slice %156 {offsets = [0, 0], sizes = [8, 32], strides = [1, 1]} : vector<8x128xf32> to vector<8x32xf32>
    %158 = arith.negf %157 : vector<8x32xf32>
    %159 = math.exp %158 : vector<8x32xf32>
    %cst_41 = arith.constant 1.000000e+00 : f32
    %160 = vector.broadcast %cst_41 : f32 to vector<8x32xf32>
    %161 = arith.addf %160, %159 : vector<8x32xf32>
    %162 = arith.divf %160, %161 : vector<8x32xf32>
    %163 = vector.extract_strided_slice %156 {offsets = [0, 32], sizes = [8, 32], strides = [1, 1]} : vector<8x128xf32> to vector<8x32xf32>
    %164 = arith.negf %163 : vector<8x32xf32>
    %165 = math.exp %164 : vector<8x32xf32>
    %cst_42 = arith.constant 1.000000e+00 : f32
    %166 = vector.broadcast %cst_42 : f32 to vector<8x32xf32>
    %167 = arith.addf %166, %165 : vector<8x32xf32>
    %168 = arith.divf %166, %167 : vector<8x32xf32>
    %169 = vector.extract_strided_slice %156 {offsets = [0, 64], sizes = [8, 32], strides = [1, 1]} : vector<8x128xf32> to vector<8x32xf32>
    %170 = math.tanh %169 : vector<8x32xf32>
    %171 = vector.extract_strided_slice %156 {offsets = [0, 96], sizes = [8, 32], strides = [1, 1]} : vector<8x128xf32> to vector<8x32xf32>
    %172 = arith.negf %171 : vector<8x32xf32>
    %173 = math.exp %172 : vector<8x32xf32>
    %cst_43 = arith.constant 1.000000e+00 : f32
    %174 = vector.broadcast %cst_43 : f32 to vector<8x32xf32>
    %175 = arith.addf %174, %173 : vector<8x32xf32>
    %176 = arith.divf %174, %175 : vector<8x32xf32>
    %177 = arith.mulf %168, %144 : vector<8x32xf32>
    %178 = arith.mulf %162, %170 : vector<8x32xf32>
    %179 = arith.addf %177, %178 : vector<8x32xf32>
    %180 = math.tanh %179 : vector<8x32xf32>
    %181 = arith.mulf %176, %180 : vector<8x32xf32>
    %182 = arith.truncf %181 : vector<8x32xf32> to vector<8x32xbf16>
    %183 = arith.index_cast %151 : i32 to index
    %c0_44 = arith.constant 0 : index
    %184 = vector.load %arg11[%183, %c0_44] : memref<64x32xbf16, #tpu.memory_space<vmem>>, vector<8x32xbf16>
    tpu.vector_store %arg11[%183, %c0_44], %182 {strides = array<i32>} : memref<64x32xbf16, #tpu.memory_space<vmem>>, vector<8x32xbf16>,
    %c5_i32 = arith.constant 5 : i32
    %c8_i32_45 = arith.constant 8 : i32
    %185 = arith.muli %c5_i32, %c8_i32_45 : i32
    %186 = tpu.assume_multiple %185, 8 : i32
    %187 = arith.index_cast %186 : i32 to index
    %c0_46 = arith.constant 0 : index
    %188 = vector.load %arg10[%187, %c0_46] : memref<64x128xf32, #tpu.memory_space<vmem>>, vector<8x128xf32>
    %189 = arith.truncf %181 : vector<8x32xf32> to vector<8x32xbf16>
    %cst_47 = arith.constant dense<0.000000e+00> : vector<8x128xf32>
    %190 = tpu.matmul %189, %7, %cst_47 {dimension_numbers = #tpu.dot_dimension_numbers<[1], [0], [0], [1], [0, 0, 1, 1], [], []>} : vector<8x32xbf16>, vector<32x128xbf16>, vector<8x128xf32> -> vector<8x128xf32>
    %191 = arith.addf %188, %190 : vector<8x128xf32>
    %192 = vector.extract_strided_slice %191 {offsets = [0, 0], sizes = [8, 32], strides = [1, 1]} : vector<8x128xf32> to vector<8x32xf32>
    %193 = arith.negf %192 : vector<8x32xf32>
    %194 = math.exp %193 : vector<8x32xf32>
    %cst_48 = arith.constant 1.000000e+00 : f32
    %195 = vector.broadcast %cst_48 : f32 to vector<8x32xf32>
    %196 = arith.addf %195, %194 : vector<8x32xf32>
    %197 = arith.divf %195, %196 : vector<8x32xf32>
    %198 = vector.extract_strided_slice %191 {offsets = [0, 32], sizes = [8, 32], strides = [1, 1]} : vector<8x128xf32> to vector<8x32xf32>
    %199 = arith.negf %198 : vector<8x32xf32>
    %200 = math.exp %199 : vector<8x32xf32>
    %cst_49 = arith.constant 1.000000e+00 : f32
    %201 = vector.broadcast %cst_49 : f32 to vector<8x32xf32>
    %202 = arith.addf %201, %200 : vector<8x32xf32>
    %203 = arith.divf %201, %202 : vector<8x32xf32>
    %204 = vector.extract_strided_slice %191 {offsets = [0, 64], sizes = [8, 32], strides = [1, 1]} : vector<8x128xf32> to vector<8x32xf32>
    %205 = math.tanh %204 : vector<8x32xf32>
    %206 = vector.extract_strided_slice %191 {offsets = [0, 96], sizes = [8, 32], strides = [1, 1]} : vector<8x128xf32> to vector<8x32xf32>
    %207 = arith.negf %206 : vector<8x32xf32>
    %208 = math.exp %207 : vector<8x32xf32>
    %cst_50 = arith.constant 1.000000e+00 : f32
    %209 = vector.broadcast %cst_50 : f32 to vector<8x32xf32>
    %210 = arith.addf %209, %208 : vector<8x32xf32>
    %211 = arith.divf %209, %210 : vector<8x32xf32>
    %212 = arith.mulf %203, %179 : vector<8x32xf32>
    %213 = arith.mulf %197, %205 : vector<8x32xf32>
    %214 = arith.addf %212, %213 : vector<8x32xf32>
    %215 = math.tanh %214 : vector<8x32xf32>
    %216 = arith.mulf %211, %215 : vector<8x32xf32>
    %217 = arith.truncf %216 : vector<8x32xf32> to vector<8x32xbf16>
    %218 = arith.index_cast %186 : i32 to index
    %c0_51 = arith.constant 0 : index
    %219 = vector.load %arg11[%218, %c0_51] : memref<64x32xbf16, #tpu.memory_space<vmem>>, vector<8x32xbf16>
    tpu.vector_store %arg11[%218, %c0_51], %217 {strides = array<i32>} : memref<64x32xbf16, #tpu.memory_space<vmem>>, vector<8x32xbf16>,
    %c6_i32 = arith.constant 6 : i32
    %c8_i32_52 = arith.constant 8 : i32
    %220 = arith.muli %c6_i32, %c8_i32_52 : i32
    %221 = tpu.assume_multiple %220, 8 : i32
    %222 = arith.index_cast %221 : i32 to index
    %c0_53 = arith.constant 0 : index
    %223 = vector.load %arg10[%222, %c0_53] : memref<64x128xf32, #tpu.memory_space<vmem>>, vector<8x128xf32>
    %224 = arith.truncf %216 : vector<8x32xf32> to vector<8x32xbf16>
    %cst_54 = arith.constant dense<0.000000e+00> : vector<8x128xf32>
    %225 = tpu.matmul %224, %7, %cst_54 {dimension_numbers = #tpu.dot_dimension_numbers<[1], [0], [0], [1], [0, 0, 1, 1], [], []>} : vector<8x32xbf16>, vector<32x128xbf16>, vector<8x128xf32> -> vector<8x128xf32>
    %226 = arith.addf %223, %225 : vector<8x128xf32>
    %227 = vector.extract_strided_slice %226 {offsets = [0, 0], sizes = [8, 32], strides = [1, 1]} : vector<8x128xf32> to vector<8x32xf32>
    %228 = arith.negf %227 : vector<8x32xf32>
    %229 = math.exp %228 : vector<8x32xf32>
    %cst_55 = arith.constant 1.000000e+00 : f32
    %230 = vector.broadcast %cst_55 : f32 to vector<8x32xf32>
    %231 = arith.addf %230, %229 : vector<8x32xf32>
    %232 = arith.divf %230, %231 : vector<8x32xf32>
    %233 = vector.extract_strided_slice %226 {offsets = [0, 32], sizes = [8, 32], strides = [1, 1]} : vector<8x128xf32> to vector<8x32xf32>
    %234 = arith.negf %233 : vector<8x32xf32>
    %235 = math.exp %234 : vector<8x32xf32>
    %cst_56 = arith.constant 1.000000e+00 : f32
    %236 = vector.broadcast %cst_56 : f32 to vector<8x32xf32>
    %237 = arith.addf %236, %235 : vector<8x32xf32>
    %238 = arith.divf %236, %237 : vector<8x32xf32>
    %239 = vector.extract_strided_slice %226 {offsets = [0, 64], sizes = [8, 32], strides = [1, 1]} : vector<8x128xf32> to vector<8x32xf32>
    %240 = math.tanh %239 : vector<8x32xf32>
    %241 = vector.extract_strided_slice %226 {offsets = [0, 96], sizes = [8, 32], strides = [1, 1]} : vector<8x128xf32> to vector<8x32xf32>
    %242 = arith.negf %241 : vector<8x32xf32>
    %243 = math.exp %242 : vector<8x32xf32>
    %cst_57 = arith.constant 1.000000e+00 : f32
    %244 = vector.broadcast %cst_57 : f32 to vector<8x32xf32>
    %245 = arith.addf %244, %243 : vector<8x32xf32>
    %246 = arith.divf %244, %245 : vector<8x32xf32>
    %247 = arith.mulf %238, %214 : vector<8x32xf32>
    %248 = arith.mulf %232, %240 : vector<8x32xf32>
    %249 = arith.addf %247, %248 : vector<8x32xf32>
    %250 = math.tanh %249 : vector<8x32xf32>
    %251 = arith.mulf %246, %250 : vector<8x32xf32>
    %252 = arith.truncf %251 : vector<8x32xf32> to vector<8x32xbf16>
    %253 = arith.index_cast %221 : i32 to index
    %c0_58 = arith.constant 0 : index
    %254 = vector.load %arg11[%253, %c0_58] : memref<64x32xbf16, #tpu.memory_space<vmem>>, vector<8x32xbf16>
    tpu.vector_store %arg11[%253, %c0_58], %252 {strides = array<i32>} : memref<64x32xbf16, #tpu.memory_space<vmem>>, vector<8x32xbf16>,
    %c7_i32 = arith.constant 7 : i32
    %c8_i32_59 = arith.constant 8 : i32
    %255 = arith.muli %c7_i32, %c8_i32_59 : i32
    %256 = tpu.assume_multiple %255, 8 : i32
    %257 = arith.index_cast %256 : i32 to index
    %c0_60 = arith.constant 0 : index
    %258 = vector.load %arg10[%257, %c0_60] : memref<64x128xf32, #tpu.memory_space<vmem>>, vector<8x128xf32>
    %259 = arith.truncf %251 : vector<8x32xf32> to vector<8x32xbf16>
    %cst_61 = arith.constant dense<0.000000e+00> : vector<8x128xf32>
    %260 = tpu.matmul %259, %7, %cst_61 {dimension_numbers = #tpu.dot_dimension_numbers<[1], [0], [0], [1], [0, 0, 1, 1], [], []>} : vector<8x32xbf16>, vector<32x128xbf16>, vector<8x128xf32> -> vector<8x128xf32>
    %261 = arith.addf %258, %260 : vector<8x128xf32>
    %262 = vector.extract_strided_slice %261 {offsets = [0, 0], sizes = [8, 32], strides = [1, 1]} : vector<8x128xf32> to vector<8x32xf32>
    %263 = arith.negf %262 : vector<8x32xf32>
    %264 = math.exp %263 : vector<8x32xf32>
    %cst_62 = arith.constant 1.000000e+00 : f32
    %265 = vector.broadcast %cst_62 : f32 to vector<8x32xf32>
    %266 = arith.addf %265, %264 : vector<8x32xf32>
    %267 = arith.divf %265, %266 : vector<8x32xf32>
    %268 = vector.extract_strided_slice %261 {offsets = [0, 32], sizes = [8, 32], strides = [1, 1]} : vector<8x128xf32> to vector<8x32xf32>
    %269 = arith.negf %268 : vector<8x32xf32>
    %270 = math.exp %269 : vector<8x32xf32>
    %cst_63 = arith.constant 1.000000e+00 : f32
    %271 = vector.broadcast %cst_63 : f32 to vector<8x32xf32>
    %272 = arith.addf %271, %270 : vector<8x32xf32>
    %273 = arith.divf %271, %272 : vector<8x32xf32>
    %274 = vector.extract_strided_slice %261 {offsets = [0, 64], sizes = [8, 32], strides = [1, 1]} : vector<8x128xf32> to vector<8x32xf32>
    %275 = math.tanh %274 : vector<8x32xf32>
    %276 = vector.extract_strided_slice %261 {offsets = [0, 96], sizes = [8, 32], strides = [1, 1]} : vector<8x128xf32> to vector<8x32xf32>
    %277 = arith.negf %276 : vector<8x32xf32>
    %278 = math.exp %277 : vector<8x32xf32>
    %cst_64 = arith.constant 1.000000e+00 : f32
    %279 = vector.broadcast %cst_64 : f32 to vector<8x32xf32>
    %280 = arith.addf %279, %278 : vector<8x32xf32>
    %281 = arith.divf %279, %280 : vector<8x32xf32>
    %282 = arith.mulf %273, %249 : vector<8x32xf32>
    %283 = arith.mulf %267, %275 : vector<8x32xf32>
    %284 = arith.addf %282, %283 : vector<8x32xf32>
    %285 = math.tanh %284 : vector<8x32xf32>
    %286 = arith.mulf %281, %285 : vector<8x32xf32>
    %287 = arith.truncf %286 : vector<8x32xf32> to vector<8x32xbf16>
    %288 = arith.index_cast %256 : i32 to index
    %c0_65 = arith.constant 0 : index
    %289 = vector.load %arg11[%288, %c0_65] : memref<64x32xbf16, #tpu.memory_space<vmem>>, vector<8x32xbf16>
    tpu.vector_store %arg11[%288, %c0_65], %287 {strides = array<i32>} : memref<64x32xbf16, #tpu.memory_space<vmem>>, vector<8x32xbf16>,
    %c8_i32_66 = arith.constant 8 : i32
    %c0_67 = arith.constant 0 : index
    %c0_68 = arith.constant 0 : index
    %290 = vector.load %arg11[%c0_67, %c0_68] : memref<64x32xbf16, #tpu.memory_space<vmem>>, vector<64x32xbf16>
    %c0_69 = arith.constant 0 : index
    %c0_70 = arith.constant 0 : index
    %291 = vector.load %arg4[%c0_69, %c0_70] : memref<32x128xbf16, #tpu.memory_space<vmem>>, vector<32x128xbf16>
    %cst_71 = arith.constant dense<0.000000e+00> : vector<64x128xf32>
    %292 = tpu.matmul %290, %291, %cst_71 {dimension_numbers = #tpu.dot_dimension_numbers<[1], [0], [0], [1], [0, 0, 1, 1], [], []>} : vector<64x32xbf16>, vector<32x128xbf16>, vector<64x128xf32> -> vector<64x128xf32>
    %c0_72 = arith.constant 0 : index
    %c0_73 = arith.constant 0 : index
    %293 = vector.load %arg6[%c0_72, %c0_73] : memref<1x128xf32, #tpu.memory_space<vmem>>, vector<1x128xf32>
    %294 = vector.broadcast %293 : vector<1x128xf32> to vector<64x128xf32>
    %295 = arith.addf %292, %294 : vector<64x128xf32>
    %c0_74 = arith.constant 0 : index
    %c0_75 = arith.constant 0 : index
    %296 = vector.load %arg10[%c0_74, %c0_75] : memref<64x128xf32, #tpu.memory_space<vmem>>, vector<64x128xf32>
    tpu.vector_store %arg10[%c0_74, %c0_75], %295 {strides = array<i32>} : memref<64x128xf32, #tpu.memory_space<vmem>>, vector<64x128xf32>,
    %c0_76 = arith.constant 0 : index
    %c0_77 = arith.constant 0 : index
    %297 = vector.load %arg5[%c0_76, %c0_77] : memref<32x128xbf16, #tpu.memory_space<vmem>>, vector<32x128xbf16>
    %cst_78 = arith.constant 0.000000e+00 : f32
    %298 = vector.broadcast %cst_78 : f32 to vector<8x32xf32>
    %cst_79 = arith.constant 0.000000e+00 : f32
    %299 = vector.broadcast %cst_79 : f32 to vector<8x32xf32>
    %c0_i32_80 = arith.constant 0 : i32
    %c8_i32_81 = arith.constant 8 : i32
    %300 = arith.muli %c0_i32_80, %c8_i32_81 : i32
    %301 = tpu.assume_multiple %300, 8 : i32
    %302 = arith.index_cast %301 : i32 to index
    %c0_82 = arith.constant 0 : index
    %303 = vector.load %arg10[%302, %c0_82] : memref<64x128xf32, #tpu.memory_space<vmem>>, vector<8x128xf32>
    %304 = arith.truncf %298 : vector<8x32xf32> to vector<8x32xbf16>
    %cst_83 = arith.constant dense<0.000000e+00> : vector<8x128xf32>
    %305 = tpu.matmul %304, %297, %cst_83 {dimension_numbers = #tpu.dot_dimension_numbers<[1], [0], [0], [1], [0, 0, 1, 1], [], []>} : vector<8x32xbf16>, vector<32x128xbf16>, vector<8x128xf32> -> vector<8x128xf32>
    %306 = arith.addf %303, %305 : vector<8x128xf32>
    %307 = vector.extract_strided_slice %306 {offsets = [0, 0], sizes = [8, 32], strides = [1, 1]} : vector<8x128xf32> to vector<8x32xf32>
    %308 = arith.negf %307 : vector<8x32xf32>
    %309 = math.exp %308 : vector<8x32xf32>
    %cst_84 = arith.constant 1.000000e+00 : f32
    %310 = vector.broadcast %cst_84 : f32 to vector<8x32xf32>
    %311 = arith.addf %310, %309 : vector<8x32xf32>
    %312 = arith.divf %310, %311 : vector<8x32xf32>
    %313 = vector.extract_strided_slice %306 {offsets = [0, 32], sizes = [8, 32], strides = [1, 1]} : vector<8x128xf32> to vector<8x32xf32>
    %314 = arith.negf %313 : vector<8x32xf32>
    %315 = math.exp %314 : vector<8x32xf32>
    %cst_85 = arith.constant 1.000000e+00 : f32
    %316 = vector.broadcast %cst_85 : f32 to vector<8x32xf32>
    %317 = arith.addf %316, %315 : vector<8x32xf32>
    %318 = arith.divf %316, %317 : vector<8x32xf32>
    %319 = vector.extract_strided_slice %306 {offsets = [0, 64], sizes = [8, 32], strides = [1, 1]} : vector<8x128xf32> to vector<8x32xf32>
    %320 = math.tanh %319 : vector<8x32xf32>
    %321 = vector.extract_strided_slice %306 {offsets = [0, 96], sizes = [8, 32], strides = [1, 1]} : vector<8x128xf32> to vector<8x32xf32>
    %322 = arith.negf %321 : vector<8x32xf32>
    %323 = math.exp %322 : vector<8x32xf32>
    %cst_86 = arith.constant 1.000000e+00 : f32
    %324 = vector.broadcast %cst_86 : f32 to vector<8x32xf32>
    %325 = arith.addf %324, %323 : vector<8x32xf32>
    %326 = arith.divf %324, %325 : vector<8x32xf32>
    %327 = arith.mulf %318, %299 : vector<8x32xf32>
    %328 = arith.mulf %312, %320 : vector<8x32xf32>
    %329 = arith.addf %327, %328 : vector<8x32xf32>
    %330 = math.tanh %329 : vector<8x32xf32>
    %331 = arith.mulf %326, %330 : vector<8x32xf32>
    %332 = arith.truncf %331 : vector<8x32xf32> to vector<8x32xbf16>
    %333 = arith.index_cast %301 : i32 to index
    %c0_87 = arith.constant 0 : index
    %334 = vector.load %arg11[%333, %c0_87] : memref<64x32xbf16, #tpu.memory_space<vmem>>, vector<8x32xbf16>
    tpu.vector_store %arg11[%333, %c0_87], %332 {strides = array<i32>} : memref<64x32xbf16, #tpu.memory_space<vmem>>, vector<8x32xbf16>,
    %c1_i32_88 = arith.constant 1 : i32
    %c8_i32_89 = arith.constant 8 : i32
    %335 = arith.muli %c1_i32_88, %c8_i32_89 : i32
    %336 = tpu.assume_multiple %335, 8 : i32
    %337 = arith.index_cast %336 : i32 to index
    %c0_90 = arith.constant 0 : index
    %338 = vector.load %arg10[%337, %c0_90] : memref<64x128xf32, #tpu.memory_space<vmem>>, vector<8x128xf32>
    %339 = arith.truncf %331 : vector<8x32xf32> to vector<8x32xbf16>
    %cst_91 = arith.constant dense<0.000000e+00> : vector<8x128xf32>
    %340 = tpu.matmul %339, %297, %cst_91 {dimension_numbers = #tpu.dot_dimension_numbers<[1], [0], [0], [1], [0, 0, 1, 1], [], []>} : vector<8x32xbf16>, vector<32x128xbf16>, vector<8x128xf32> -> vector<8x128xf32>
    %341 = arith.addf %338, %340 : vector<8x128xf32>
    %342 = vector.extract_strided_slice %341 {offsets = [0, 0], sizes = [8, 32], strides = [1, 1]} : vector<8x128xf32> to vector<8x32xf32>
    %343 = arith.negf %342 : vector<8x32xf32>
    %344 = math.exp %343 : vector<8x32xf32>
    %cst_92 = arith.constant 1.000000e+00 : f32
    %345 = vector.broadcast %cst_92 : f32 to vector<8x32xf32>
    %346 = arith.addf %345, %344 : vector<8x32xf32>
    %347 = arith.divf %345, %346 : vector<8x32xf32>
    %348 = vector.extract_strided_slice %341 {offsets = [0, 32], sizes = [8, 32], strides = [1, 1]} : vector<8x128xf32> to vector<8x32xf32>
    %349 = arith.negf %348 : vector<8x32xf32>
    %350 = math.exp %349 : vector<8x32xf32>
    %cst_93 = arith.constant 1.000000e+00 : f32
    %351 = vector.broadcast %cst_93 : f32 to vector<8x32xf32>
    %352 = arith.addf %351, %350 : vector<8x32xf32>
    %353 = arith.divf %351, %352 : vector<8x32xf32>
    %354 = vector.extract_strided_slice %341 {offsets = [0, 64], sizes = [8, 32], strides = [1, 1]} : vector<8x128xf32> to vector<8x32xf32>
    %355 = math.tanh %354 : vector<8x32xf32>
    %356 = vector.extract_strided_slice %341 {offsets = [0, 96], sizes = [8, 32], strides = [1, 1]} : vector<8x128xf32> to vector<8x32xf32>
    %357 = arith.negf %356 : vector<8x32xf32>
    %358 = math.exp %357 : vector<8x32xf32>
    %cst_94 = arith.constant 1.000000e+00 : f32
    %359 = vector.broadcast %cst_94 : f32 to vector<8x32xf32>
    %360 = arith.addf %359, %358 : vector<8x32xf32>
    %361 = arith.divf %359, %360 : vector<8x32xf32>
    %362 = arith.mulf %353, %329 : vector<8x32xf32>
    %363 = arith.mulf %347, %355 : vector<8x32xf32>
    %364 = arith.addf %362, %363 : vector<8x32xf32>
    %365 = math.tanh %364 : vector<8x32xf32>
    %366 = arith.mulf %361, %365 : vector<8x32xf32>
    %367 = arith.truncf %366 : vector<8x32xf32> to vector<8x32xbf16>
    %368 = arith.index_cast %336 : i32 to index
    %c0_95 = arith.constant 0 : index
    %369 = vector.load %arg11[%368, %c0_95] : memref<64x32xbf16, #tpu.memory_space<vmem>>, vector<8x32xbf16>
    tpu.vector_store %arg11[%368, %c0_95], %367 {strides = array<i32>} : memref<64x32xbf16, #tpu.memory_space<vmem>>, vector<8x32xbf16>,
    %c2_i32_96 = arith.constant 2 : i32
    %c8_i32_97 = arith.constant 8 : i32
    %370 = arith.muli %c2_i32_96, %c8_i32_97 : i32
    %371 = tpu.assume_multiple %370, 8 : i32
    %372 = arith.index_cast %371 : i32 to index
    %c0_98 = arith.constant 0 : index
    %373 = vector.load %arg10[%372, %c0_98] : memref<64x128xf32, #tpu.memory_space<vmem>>, vector<8x128xf32>
    %374 = arith.truncf %366 : vector<8x32xf32> to vector<8x32xbf16>
    %cst_99 = arith.constant dense<0.000000e+00> : vector<8x128xf32>
    %375 = tpu.matmul %374, %297, %cst_99 {dimension_numbers = #tpu.dot_dimension_numbers<[1], [0], [0], [1], [0, 0, 1, 1], [], []>} : vector<8x32xbf16>, vector<32x128xbf16>, vector<8x128xf32> -> vector<8x128xf32>
    %376 = arith.addf %373, %375 : vector<8x128xf32>
    %377 = vector.extract_strided_slice %376 {offsets = [0, 0], sizes = [8, 32], strides = [1, 1]} : vector<8x128xf32> to vector<8x32xf32>
    %378 = arith.negf %377 : vector<8x32xf32>
    %379 = math.exp %378 : vector<8x32xf32>
    %cst_100 = arith.constant 1.000000e+00 : f32
    %380 = vector.broadcast %cst_100 : f32 to vector<8x32xf32>
    %381 = arith.addf %380, %379 : vector<8x32xf32>
    %382 = arith.divf %380, %381 : vector<8x32xf32>
    %383 = vector.extract_strided_slice %376 {offsets = [0, 32], sizes = [8, 32], strides = [1, 1]} : vector<8x128xf32> to vector<8x32xf32>
    %384 = arith.negf %383 : vector<8x32xf32>
    %385 = math.exp %384 : vector<8x32xf32>
    %cst_101 = arith.constant 1.000000e+00 : f32
    %386 = vector.broadcast %cst_101 : f32 to vector<8x32xf32>
    %387 = arith.addf %386, %385 : vector<8x32xf32>
    %388 = arith.divf %386, %387 : vector<8x32xf32>
    %389 = vector.extract_strided_slice %376 {offsets = [0, 64], sizes = [8, 32], strides = [1, 1]} : vector<8x128xf32> to vector<8x32xf32>
    %390 = math.tanh %389 : vector<8x32xf32>
    %391 = vector.extract_strided_slice %376 {offsets = [0, 96], sizes = [8, 32], strides = [1, 1]} : vector<8x128xf32> to vector<8x32xf32>
    %392 = arith.negf %391 : vector<8x32xf32>
    %393 = math.exp %392 : vector<8x32xf32>
    %cst_102 = arith.constant 1.000000e+00 : f32
    %394 = vector.broadcast %cst_102 : f32 to vector<8x32xf32>
    %395 = arith.addf %394, %393 : vector<8x32xf32>
    %396 = arith.divf %394, %395 : vector<8x32xf32>
    %397 = arith.mulf %388, %364 : vector<8x32xf32>
    %398 = arith.mulf %382, %390 : vector<8x32xf32>
    %399 = arith.addf %397, %398 : vector<8x32xf32>
    %400 = math.tanh %399 : vector<8x32xf32>
    %401 = arith.mulf %396, %400 : vector<8x32xf32>
    %402 = arith.truncf %401 : vector<8x32xf32> to vector<8x32xbf16>
    %403 = arith.index_cast %371 : i32 to index
    %c0_103 = arith.constant 0 : index
    %404 = vector.load %arg11[%403, %c0_103] : memref<64x32xbf16, #tpu.memory_space<vmem>>, vector<8x32xbf16>
    tpu.vector_store %arg11[%403, %c0_103], %402 {strides = array<i32>} : memref<64x32xbf16, #tpu.memory_space<vmem>>, vector<8x32xbf16>,
    %c3_i32_104 = arith.constant 3 : i32
    %c8_i32_105 = arith.constant 8 : i32
    %405 = arith.muli %c3_i32_104, %c8_i32_105 : i32
    %406 = tpu.assume_multiple %405, 8 : i32
    %407 = arith.index_cast %406 : i32 to index
    %c0_106 = arith.constant 0 : index
    %408 = vector.load %arg10[%407, %c0_106] : memref<64x128xf32, #tpu.memory_space<vmem>>, vector<8x128xf32>
    %409 = arith.truncf %401 : vector<8x32xf32> to vector<8x32xbf16>
    %cst_107 = arith.constant dense<0.000000e+00> : vector<8x128xf32>
    %410 = tpu.matmul %409, %297, %cst_107 {dimension_numbers = #tpu.dot_dimension_numbers<[1], [0], [0], [1], [0, 0, 1, 1], [], []>} : vector<8x32xbf16>, vector<32x128xbf16>, vector<8x128xf32> -> vector<8x128xf32>
    %411 = arith.addf %408, %410 : vector<8x128xf32>
    %412 = vector.extract_strided_slice %411 {offsets = [0, 0], sizes = [8, 32], strides = [1, 1]} : vector<8x128xf32> to vector<8x32xf32>
    %413 = arith.negf %412 : vector<8x32xf32>
    %414 = math.exp %413 : vector<8x32xf32>
    %cst_108 = arith.constant 1.000000e+00 : f32
    %415 = vector.broadcast %cst_108 : f32 to vector<8x32xf32>
    %416 = arith.addf %415, %414 : vector<8x32xf32>
    %417 = arith.divf %415, %416 : vector<8x32xf32>
    %418 = vector.extract_strided_slice %411 {offsets = [0, 32], sizes = [8, 32], strides = [1, 1]} : vector<8x128xf32> to vector<8x32xf32>
    %419 = arith.negf %418 : vector<8x32xf32>
    %420 = math.exp %419 : vector<8x32xf32>
    %cst_109 = arith.constant 1.000000e+00 : f32
    %421 = vector.broadcast %cst_109 : f32 to vector<8x32xf32>
    %422 = arith.addf %421, %420 : vector<8x32xf32>
    %423 = arith.divf %421, %422 : vector<8x32xf32>
    %424 = vector.extract_strided_slice %411 {offsets = [0, 64], sizes = [8, 32], strides = [1, 1]} : vector<8x128xf32> to vector<8x32xf32>
    %425 = math.tanh %424 : vector<8x32xf32>
    %426 = vector.extract_strided_slice %411 {offsets = [0, 96], sizes = [8, 32], strides = [1, 1]} : vector<8x128xf32> to vector<8x32xf32>
    %427 = arith.negf %426 : vector<8x32xf32>
    %428 = math.exp %427 : vector<8x32xf32>
    %cst_110 = arith.constant 1.000000e+00 : f32
    %429 = vector.broadcast %cst_110 : f32 to vector<8x32xf32>
    %430 = arith.addf %429, %428 : vector<8x32xf32>
    %431 = arith.divf %429, %430 : vector<8x32xf32>
    %432 = arith.mulf %423, %399 : vector<8x32xf32>
    %433 = arith.mulf %417, %425 : vector<8x32xf32>
    %434 = arith.addf %432, %433 : vector<8x32xf32>
    %435 = math.tanh %434 : vector<8x32xf32>
    %436 = arith.mulf %431, %435 : vector<8x32xf32>
    %437 = arith.truncf %436 : vector<8x32xf32> to vector<8x32xbf16>
    %438 = arith.index_cast %406 : i32 to index
    %c0_111 = arith.constant 0 : index
    %439 = vector.load %arg11[%438, %c0_111] : memref<64x32xbf16, #tpu.memory_space<vmem>>, vector<8x32xbf16>
    tpu.vector_store %arg11[%438, %c0_111], %437 {strides = array<i32>} : memref<64x32xbf16, #tpu.memory_space<vmem>>, vector<8x32xbf16>,
    %c4_i32_112 = arith.constant 4 : i32
    %c8_i32_113 = arith.constant 8 : i32
    %440 = arith.muli %c4_i32_112, %c8_i32_113 : i32
    %441 = tpu.assume_multiple %440, 8 : i32
    %442 = arith.index_cast %441 : i32 to index
    %c0_114 = arith.constant 0 : index
    %443 = vector.load %arg10[%442, %c0_114] : memref<64x128xf32, #tpu.memory_space<vmem>>, vector<8x128xf32>
    %444 = arith.truncf %436 : vector<8x32xf32> to vector<8x32xbf16>
    %cst_115 = arith.constant dense<0.000000e+00> : vector<8x128xf32>
    %445 = tpu.matmul %444, %297, %cst_115 {dimension_numbers = #tpu.dot_dimension_numbers<[1], [0], [0], [1], [0, 0, 1, 1], [], []>} : vector<8x32xbf16>, vector<32x128xbf16>, vector<8x128xf32> -> vector<8x128xf32>
    %446 = arith.addf %443, %445 : vector<8x128xf32>
    %447 = vector.extract_strided_slice %446 {offsets = [0, 0], sizes = [8, 32], strides = [1, 1]} : vector<8x128xf32> to vector<8x32xf32>
    %448 = arith.negf %447 : vector<8x32xf32>
    %449 = math.exp %448 : vector<8x32xf32>
    %cst_116 = arith.constant 1.000000e+00 : f32
    %450 = vector.broadcast %cst_116 : f32 to vector<8x32xf32>
    %451 = arith.addf %450, %449 : vector<8x32xf32>
    %452 = arith.divf %450, %451 : vector<8x32xf32>
    %453 = vector.extract_strided_slice %446 {offsets = [0, 32], sizes = [8, 32], strides = [1, 1]} : vector<8x128xf32> to vector<8x32xf32>
    %454 = arith.negf %453 : vector<8x32xf32>
    %455 = math.exp %454 : vector<8x32xf32>
    %cst_117 = arith.constant 1.000000e+00 : f32
    %456 = vector.broadcast %cst_117 : f32 to vector<8x32xf32>
    %457 = arith.addf %456, %455 : vector<8x32xf32>
    %458 = arith.divf %456, %457 : vector<8x32xf32>
    %459 = vector.extract_strided_slice %446 {offsets = [0, 64], sizes = [8, 32], strides = [1, 1]} : vector<8x128xf32> to vector<8x32xf32>
    %460 = math.tanh %459 : vector<8x32xf32>
    %461 = vector.extract_strided_slice %446 {offsets = [0, 96], sizes = [8, 32], strides = [1, 1]} : vector<8x128xf32> to vector<8x32xf32>
    %462 = arith.negf %461 : vector<8x32xf32>
    %463 = math.exp %462 : vector<8x32xf32>
    %cst_118 = arith.constant 1.000000e+00 : f32
    %464 = vector.broadcast %cst_118 : f32 to vector<8x32xf32>
    %465 = arith.addf %464, %463 : vector<8x32xf32>
    %466 = arith.divf %464, %465 : vector<8x32xf32>
    %467 = arith.mulf %458, %434 : vector<8x32xf32>
    %468 = arith.mulf %452, %460 : vector<8x32xf32>
    %469 = arith.addf %467, %468 : vector<8x32xf32>
    %470 = math.tanh %469 : vector<8x32xf32>
    %471 = arith.mulf %466, %470 : vector<8x32xf32>
    %472 = arith.truncf %471 : vector<8x32xf32> to vector<8x32xbf16>
    %473 = arith.index_cast %441 : i32 to index
    %c0_119 = arith.constant 0 : index
    %474 = vector.load %arg11[%473, %c0_119] : memref<64x32xbf16, #tpu.memory_space<vmem>>, vector<8x32xbf16>
    tpu.vector_store %arg11[%473, %c0_119], %472 {strides = array<i32>} : memref<64x32xbf16, #tpu.memory_space<vmem>>, vector<8x32xbf16>,
    %c5_i32_120 = arith.constant 5 : i32
    %c8_i32_121 = arith.constant 8 : i32
    %475 = arith.muli %c5_i32_120, %c8_i32_121 : i32
    %476 = tpu.assume_multiple %475, 8 : i32
    %477 = arith.index_cast %476 : i32 to index
    %c0_122 = arith.constant 0 : index
    %478 = vector.load %arg10[%477, %c0_122] : memref<64x128xf32, #tpu.memory_space<vmem>>, vector<8x128xf32>
    %479 = arith.truncf %471 : vector<8x32xf32> to vector<8x32xbf16>
    %cst_123 = arith.constant dense<0.000000e+00> : vector<8x128xf32>
    %480 = tpu.matmul %479, %297, %cst_123 {dimension_numbers = #tpu.dot_dimension_numbers<[1], [0], [0], [1], [0, 0, 1, 1], [], []>} : vector<8x32xbf16>, vector<32x128xbf16>, vector<8x128xf32> -> vector<8x128xf32>
    %481 = arith.addf %478, %480 : vector<8x128xf32>
    %482 = vector.extract_strided_slice %481 {offsets = [0, 0], sizes = [8, 32], strides = [1, 1]} : vector<8x128xf32> to vector<8x32xf32>
    %483 = arith.negf %482 : vector<8x32xf32>
    %484 = math.exp %483 : vector<8x32xf32>
    %cst_124 = arith.constant 1.000000e+00 : f32
    %485 = vector.broadcast %cst_124 : f32 to vector<8x32xf32>
    %486 = arith.addf %485, %484 : vector<8x32xf32>
    %487 = arith.divf %485, %486 : vector<8x32xf32>
    %488 = vector.extract_strided_slice %481 {offsets = [0, 32], sizes = [8, 32], strides = [1, 1]} : vector<8x128xf32> to vector<8x32xf32>
    %489 = arith.negf %488 : vector<8x32xf32>
    %490 = math.exp %489 : vector<8x32xf32>
    %cst_125 = arith.constant 1.000000e+00 : f32
    %491 = vector.broadcast %cst_125 : f32 to vector<8x32xf32>
    %492 = arith.addf %491, %490 : vector<8x32xf32>
    %493 = arith.divf %491, %492 : vector<8x32xf32>
    %494 = vector.extract_strided_slice %481 {offsets = [0, 64], sizes = [8, 32], strides = [1, 1]} : vector<8x128xf32> to vector<8x32xf32>
    %495 = math.tanh %494 : vector<8x32xf32>
    %496 = vector.extract_strided_slice %481 {offsets = [0, 96], sizes = [8, 32], strides = [1, 1]} : vector<8x128xf32> to vector<8x32xf32>
    %497 = arith.negf %496 : vector<8x32xf32>
    %498 = math.exp %497 : vector<8x32xf32>
    %cst_126 = arith.constant 1.000000e+00 : f32
    %499 = vector.broadcast %cst_126 : f32 to vector<8x32xf32>
    %500 = arith.addf %499, %498 : vector<8x32xf32>
    %501 = arith.divf %499, %500 : vector<8x32xf32>
    %502 = arith.mulf %493, %469 : vector<8x32xf32>
    %503 = arith.mulf %487, %495 : vector<8x32xf32>
    %504 = arith.addf %502, %503 : vector<8x32xf32>
    %505 = math.tanh %504 : vector<8x32xf32>
    %506 = arith.mulf %501, %505 : vector<8x32xf32>
    %507 = arith.truncf %506 : vector<8x32xf32> to vector<8x32xbf16>
    %508 = arith.index_cast %476 : i32 to index
    %c0_127 = arith.constant 0 : index
    %509 = vector.load %arg11[%508, %c0_127] : memref<64x32xbf16, #tpu.memory_space<vmem>>, vector<8x32xbf16>
    tpu.vector_store %arg11[%508, %c0_127], %507 {strides = array<i32>} : memref<64x32xbf16, #tpu.memory_space<vmem>>, vector<8x32xbf16>,
    %c6_i32_128 = arith.constant 6 : i32
    %c8_i32_129 = arith.constant 8 : i32
    %510 = arith.muli %c6_i32_128, %c8_i32_129 : i32
    %511 = tpu.assume_multiple %510, 8 : i32
    %512 = arith.index_cast %511 : i32 to index
    %c0_130 = arith.constant 0 : index
    %513 = vector.load %arg10[%512, %c0_130] : memref<64x128xf32, #tpu.memory_space<vmem>>, vector<8x128xf32>
    %514 = arith.truncf %506 : vector<8x32xf32> to vector<8x32xbf16>
    %cst_131 = arith.constant dense<0.000000e+00> : vector<8x128xf32>
    %515 = tpu.matmul %514, %297, %cst_131 {dimension_numbers = #tpu.dot_dimension_numbers<[1], [0], [0], [1], [0, 0, 1, 1], [], []>} : vector<8x32xbf16>, vector<32x128xbf16>, vector<8x128xf32> -> vector<8x128xf32>
    %516 = arith.addf %513, %515 : vector<8x128xf32>
    %517 = vector.extract_strided_slice %516 {offsets = [0, 0], sizes = [8, 32], strides = [1, 1]} : vector<8x128xf32> to vector<8x32xf32>
    %518 = arith.negf %517 : vector<8x32xf32>
    %519 = math.exp %518 : vector<8x32xf32>
    %cst_132 = arith.constant 1.000000e+00 : f32
    %520 = vector.broadcast %cst_132 : f32 to vector<8x32xf32>
    %521 = arith.addf %520, %519 : vector<8x32xf32>
    %522 = arith.divf %520, %521 : vector<8x32xf32>
    %523 = vector.extract_strided_slice %516 {offsets = [0, 32], sizes = [8, 32], strides = [1, 1]} : vector<8x128xf32> to vector<8x32xf32>
    %524 = arith.negf %523 : vector<8x32xf32>
    %525 = math.exp %524 : vector<8x32xf32>
    %cst_133 = arith.constant 1.000000e+00 : f32
    %526 = vector.broadcast %cst_133 : f32 to vector<8x32xf32>
    %527 = arith.addf %526, %525 : vector<8x32xf32>
    %528 = arith.divf %526, %527 : vector<8x32xf32>
    %529 = vector.extract_strided_slice %516 {offsets = [0, 64], sizes = [8, 32], strides = [1, 1]} : vector<8x128xf32> to vector<8x32xf32>
    %530 = math.tanh %529 : vector<8x32xf32>
    %531 = vector.extract_strided_slice %516 {offsets = [0, 96], sizes = [8, 32], strides = [1, 1]} : vector<8x128xf32> to vector<8x32xf32>
    %532 = arith.negf %531 : vector<8x32xf32>
    %533 = math.exp %532 : vector<8x32xf32>
    %cst_134 = arith.constant 1.000000e+00 : f32
    %534 = vector.broadcast %cst_134 : f32 to vector<8x32xf32>
    %535 = arith.addf %534, %533 : vector<8x32xf32>
    %536 = arith.divf %534, %535 : vector<8x32xf32>
    %537 = arith.mulf %528, %504 : vector<8x32xf32>
    %538 = arith.mulf %522, %530 : vector<8x32xf32>
    %539 = arith.addf %537, %538 : vector<8x32xf32>
    %540 = math.tanh %539 : vector<8x32xf32>
    %541 = arith.mulf %536, %540 : vector<8x32xf32>
    %542 = arith.truncf %541 : vector<8x32xf32> to vector<8x32xbf16>
    %543 = arith.index_cast %511 : i32 to index
    %c0_135 = arith.constant 0 : index
    %544 = vector.load %arg11[%543, %c0_135] : memref<64x32xbf16, #tpu.memory_space<vmem>>, vector<8x32xbf16>
    tpu.vector_store %arg11[%543, %c0_135], %542 {strides = array<i32>} : memref<64x32xbf16, #tpu.memory_space<vmem>>, vector<8x32xbf16>,
    %c7_i32_136 = arith.constant 7 : i32
    %c8_i32_137 = arith.constant 8 : i32
    %545 = arith.muli %c7_i32_136, %c8_i32_137 : i32
    %546 = tpu.assume_multiple %545, 8 : i32
    %547 = arith.index_cast %546 : i32 to index
    %c0_138 = arith.constant 0 : index
    %548 = vector.load %arg10[%547, %c0_138] : memref<64x128xf32, #tpu.memory_space<vmem>>, vector<8x128xf32>
    %549 = arith.truncf %541 : vector<8x32xf32> to vector<8x32xbf16>
    %cst_139 = arith.constant dense<0.000000e+00> : vector<8x128xf32>
    %550 = tpu.matmul %549, %297, %cst_139 {dimension_numbers = #tpu.dot_dimension_numbers<[1], [0], [0], [1], [0, 0, 1, 1], [], []>} : vector<8x32xbf16>, vector<32x128xbf16>, vector<8x128xf32> -> vector<8x128xf32>
    %551 = arith.addf %548, %550 : vector<8x128xf32>
    %552 = vector.extract_strided_slice %551 {offsets = [0, 0], sizes = [8, 32], strides = [1, 1]} : vector<8x128xf32> to vector<8x32xf32>
    %553 = arith.negf %552 : vector<8x32xf32>
    %554 = math.exp %553 : vector<8x32xf32>
    %cst_140 = arith.constant 1.000000e+00 : f32
    %555 = vector.broadcast %cst_140 : f32 to vector<8x32xf32>
    %556 = arith.addf %555, %554 : vector<8x32xf32>
    %557 = arith.divf %555, %556 : vector<8x32xf32>
    %558 = vector.extract_strided_slice %551 {offsets = [0, 32], sizes = [8, 32], strides = [1, 1]} : vector<8x128xf32> to vector<8x32xf32>
    %559 = arith.negf %558 : vector<8x32xf32>
    %560 = math.exp %559 : vector<8x32xf32>
    %cst_141 = arith.constant 1.000000e+00 : f32
    %561 = vector.broadcast %cst_141 : f32 to vector<8x32xf32>
    %562 = arith.addf %561, %560 : vector<8x32xf32>
    %563 = arith.divf %561, %562 : vector<8x32xf32>
    %564 = vector.extract_strided_slice %551 {offsets = [0, 64], sizes = [8, 32], strides = [1, 1]} : vector<8x128xf32> to vector<8x32xf32>
    %565 = math.tanh %564 : vector<8x32xf32>
    %566 = vector.extract_strided_slice %551 {offsets = [0, 96], sizes = [8, 32], strides = [1, 1]} : vector<8x128xf32> to vector<8x32xf32>
    %567 = arith.negf %566 : vector<8x32xf32>
    %568 = math.exp %567 : vector<8x32xf32>
    %cst_142 = arith.constant 1.000000e+00 : f32
    %569 = vector.broadcast %cst_142 : f32 to vector<8x32xf32>
    %570 = arith.addf %569, %568 : vector<8x32xf32>
    %571 = arith.divf %569, %570 : vector<8x32xf32>
    %572 = arith.mulf %563, %539 : vector<8x32xf32>
    %573 = arith.mulf %557, %565 : vector<8x32xf32>
    %574 = arith.addf %572, %573 : vector<8x32xf32>
    %575 = math.tanh %574 : vector<8x32xf32>
    %576 = arith.mulf %571, %575 : vector<8x32xf32>
    %577 = arith.truncf %576 : vector<8x32xf32> to vector<8x32xbf16>
    %578 = arith.index_cast %546 : i32 to index
    %c0_143 = arith.constant 0 : index
    %579 = vector.load %arg11[%578, %c0_143] : memref<64x32xbf16, #tpu.memory_space<vmem>>, vector<8x32xbf16>
    tpu.vector_store %arg11[%578, %c0_143], %577 {strides = array<i32>} : memref<64x32xbf16, #tpu.memory_space<vmem>>, vector<8x32xbf16>,
    %c8_i32_144 = arith.constant 8 : i32
    %c0_145 = arith.constant 0 : index
    %c0_146 = arith.constant 0 : index
    %580 = vector.load %arg11[%c0_145, %c0_146] : memref<64x32xbf16, #tpu.memory_space<vmem>>, vector<64x32xbf16>
    %c0_147 = arith.constant 0 : index
    %c0_148 = arith.constant 0 : index
    %581 = vector.load %arg7[%c0_147, %c0_148] : memref<32x128xbf16, #tpu.memory_space<vmem>>, vector<32x128xbf16>
    %cst_149 = arith.constant dense<0.000000e+00> : vector<64x128xf32>
    %582 = tpu.matmul %580, %581, %cst_149 {dimension_numbers = #tpu.dot_dimension_numbers<[1], [0], [0], [1], [0, 0, 1, 1], [], []>} : vector<64x32xbf16>, vector<32x128xbf16>, vector<64x128xf32> -> vector<64x128xf32>
    %c0_150 = arith.constant 0 : index
    %c0_151 = arith.constant 0 : index
    %583 = vector.load %arg8[%c0_150, %c0_151] : memref<1x128xf32, #tpu.memory_space<vmem>>, vector<1x128xf32>
    %584 = vector.broadcast %583 : vector<1x128xf32> to vector<64x128xf32>
    %585 = arith.addf %582, %584 : vector<64x128xf32>
    %c0_152 = arith.constant 0 : index
    %c0_153 = arith.constant 0 : index
    %586 = vector.load %arg9[%c0_152, %c0_153] : memref<64x128xf32, #tpu.memory_space<vmem>>, vector<64x128xf32>
    tpu.vector_store %arg9[%c0_152, %c0_153], %585 {strides = array<i32>} : memref<64x128xf32, #tpu.memory_space<vmem>>, vector<64x128xf32>,
    return
  }
}

</mosaic_0001>

<bundles_post_ra>
// kernel: lstmnet_forward.1
= control target key start
LH: loop header
LB: loop body
LE: loop exit
PB: predicated region body
PF: predicated region fallthrough
CT: control target
= control target key end

     0   :  { %vm73_vm0 = vcmask 130048   ;;  %v1683_v5 = vmov 0   ;;  %s1684_s19 = smov 64   ;;  %s1685_s20 = smov 32   ;;  %vm140_vm5 = vcmask 261120   ;;  %s2077_s1 = inlined_call_operand.vmem [shape: bf16[16,128], index: 1, kind: input, shape index: {}]   ;;  %s2078_s0 = inlined_call_operand.vmem [shape: bf16[64,16], index: 0, kind: input, shape index: {}]   ;;  %s2079_s2 = inlined_call_operand.vmem [shape: bf16[32,128], index: 2, kind: input, shape index: {}]   ;;  %s2080_s3 = inlined_call_operand.vmem [shape: f32[1,128], index: 3, kind: input, shape index: {}]   ;;  %s2081_s4 = inlined_call_operand.vmem [shape: bf16[32,128], index: 4, kind: input, shape index: {}]   ;;  %s2082_s6 = inlined_call_operand.vmem [shape: f32[1,128], index: 6, kind: input, shape index: {}]   ;;  %s2083_s5 = inlined_call_operand.vmem [shape: bf16[32,128], index: 5, kind: input, shape index: {}]   ;;  %s2084_s7 = inlined_call_operand.vmem [shape: bf16[32,128], index: 7, kind: input, shape index: {}]   ;;  %s2085_s8 = inlined_call_operand.vmem [shape: f32[1,128], index: 8, kind: input, shape index: {}]   ;;  %s2086_s9 = inlined_call_operand.vmem [shape: f32[64,128], index: 9, kind: output, shape index: {}]  }
   0x1   :  { %v1528_v0 = vld [vmem:[%s2077_s1] sm:$0xff]  ;;  %v1742_v1 = vld [vmem:[%s2079_s2 + $0x8] sm:$0xff]  ;;  %v1526_v34 = vld [vmem:[%s2078_s0 + $0x10] sm:$0xff] }
   0x2   :  { %v1525_v2 = vld [vmem:[%s2078_s0 + $0x8] sm:$0xff]  ;;  %v1524_v3 = vld [vmem:[%s2078_s0] sm:$0xff]  ;;  %1545 = vmatpush.bf16.msra.mxu1 %v1528_v0  ;;  %93 = vmatpush.bf16.msra.mxu0 %v1528_v0 }
   0x3   :  { %v1754_v4 = vld [vmem:[%s2079_s2] sm:$0xff]  ;;  %1546 = vmatpush.bf16.msra.mxu2 %v1528_v0  ;;  %1547 = vmatpush.bf16.msra.mxu3 %v1528_v0 }
   0x4   :  { %v1775_v8 = vld [vmem:[%s2080_s3] ss:$0 sm:$0xff] }
   0x5   :  { %1419 = vmatmul.msk.bf16.vlgmr.msra.gmra.mxu1 %vm73_vm0, %v1525_v2  ;;  %1418 = vmatmul.msk.bf16.vlgmr.msra.gmra.mxu0 %vm73_vm0, %v1524_v3 }
   0x6   :  { %150 = vmatpush.bf16.msrb.mxu1 %v1742_v1  ;;  %1420 = vmatmul.msk.bf16.vlgmr.msra.gmra.mxu2 %vm73_vm0, %v1526_v34 }
   0x7   :  { %217 = vmatpush.bf16.msrb.mxu2 %v1742_v1  ;;  %284 = vmatpush.bf16.msrb.mxu3 %v1742_v1 }
   0xa   :  { %151 = vmatpush.bf16.msrb.mxu1 %v1754_v4 }
   0xb   :  { %218 = vmatpush.bf16.msrb.mxu2 %v1754_v4  ;;  %285 = vmatpush.bf16.msrb.mxu3 %v1754_v4 }
   0xe   :  { %351 = vmatpush.bf16.msra.mxu1 %v1742_v1 }
   0xf   :  { %418 = vmatpush.bf16.msra.mxu2 %v1742_v1 }
  0x12   :  { %352 = vmatpush.bf16.msra.mxu1 %v1754_v4 }
  0x13   :  { %419 = vmatpush.bf16.msra.mxu2 %v1754_v4 }
  0x15   :  { %152 = vmatmul.bf16.vlgmr.msrb.gmra.mxu1 %v1683_v5 }
  0x16   :  { %552 = vmatpush.bf16.msrb.mxu1 %v1742_v1 }
  0x1a   :  { %553 = vmatpush.bf16.msrb.mxu1 %v1754_v4 }
  0x82   :  { %v1768_v6 = vpop.f32.mrf.mxu1  ;;  %v95_v9 = vpop.f32.mrf.mxu0 }
  0x83   :  { %v96_v10 = vadd.f32 %v1775_v8, %v95_v9 }
  0x89   :  { %v1794_v41 = vpop.f32.mrf.mxu2 }
  0x8a   :  { %v1770_v7 = vpop.f32.mrf.mxu1  ;;  %v97_v43 = vpop.f32.mrf.mxu0 }
  0x8b   :  { %v98_v44 = vadd.f32 %v1775_v8, %v97_v43 }
  0x91   :  { %v1796_v42 = vpop.f32.mrf.mxu2 }
  0x92   :  { %v153_v11 = vpop.f32.mrf.mxu1 }
  0x93   :  { %v157_v12 = vadd.f32 %v153_v11, %v96_v10  ;;  %v1527_v10 = vld [vmem:[%s2078_s0 + $0x18] sm:$0xff] }
  0x94   :  { %1421 = vmatmul.msk.bf16.vlgmr.msra.gmra.mxu3 %vm73_vm0, %v1527_v10 }
  0x95   :  { %1554 = vtanh.f32 %v157_v12  ;;  %v1430_v15 = vmul.f32 -1.442695, %v157_v12  ;;  %485 = vmatpush.bf16.msra.mxu3 %v1742_v1 }
  0x97   :  { %1556 = vpow2.f32 %v1430_v15 }
  0x99   :  { %486 = vmatpush.bf16.msra.mxu3 %v1754_v4 }
  0x9a   :  { %v155_v13 = vpop.f32.mrf.mxu1 }
  0x9b   :  { %v1555_v14 = vpop.eup %1554 }
  0x9c   :  { %180 = vrot.lane.b32.xlu0 %v1555_v14, %s1684_s19 }
  0x9d   :  { %v1557_v16 = vpop.eup %1556 }
  0x9e   :  { %v161_v17 = vadd.f32 1.0, %v1557_v16 }
  0xa0   :  { %1558 = vrcp.f32 %v161_v17  ;;  %v173_v23 = vand.u32 2147483648, %v161_v17  ;;  %vm167_vm2 = vweird.f32 %v161_v17  ;;  %v171_v24 = vand.u32 2147483647, %v161_v17 }
  0xa2   :  { %v174_v26 = vor.u32 1.1754944e-38, %v173_v23  ;;  %vm172_vm4 = vcmp.eq.f32.partialorder %v171_v24, 8.507059e+37 }
  0xa6   :  { %v1559_v18 = vpop.eup %1558 }
  0xa7   :  { %v163_v19 = vmul.f32 %v1559_v18, %v161_v17  ;;  %vm168_vm1 = vweird.f32 %v1559_v18 }
  0xa8   :  { %vm169_vm3 = vmor %vm167_vm2, %vm168_vm1 }
  0xa9   :  { %v164_v20 = vsub.f32 1.0, %v163_v19 }
  0xab   :  { %v165_v21 = vmul.f32 %v1559_v18, %v164_v20 }
  0xad   :  { %v166_v22 = vadd.f32 %v1559_v18, %v165_v21 }
  0xaf   :  { %v170_v25 = vsel %vm169_vm3, %v1559_v18, %v166_v22 }
  0xb0   :  { %v175_v28 = vsel %vm172_vm4, %v174_v26, %v170_v25 }
  0xb1   :  { %v178_v30 = vmul.f32 0.0, %v175_v28 }
 0x10e   :  { %v181_v27 = vpop.permute.xlu0 %180 }
 0x10f   :  { %v183_v29 = vmul.f32 %v181_v27, %v175_v28 }
 0x111   :  { %185 = vrot.lane.b32.xlu0 %v183_v29, %s1685_s20 }
 0x117   :  { %v1813_v17 = vpop.f32.mrf.mxu3 }
 0x11f   :  { %v1815_v18 = vpop.f32.mrf.mxu3 }
 0x183   :  { %v186_v31 = vpop.permute.xlu0 %185 }
 0x184   :  { %v188_v32 = vadd.f32 %v186_v31, %v178_v30 }
 0x186   :  { %1560 = vtanh.f32 %v188_v32 }
 0x18c   :  { %v1561_v33 = vpop.eup %1560 }
 0x18d   :  { %191 = vrot.lane.b32.xlu1 %v1561_v33, %s1684_s19 }
 0x1ff   :  { %v192_v35 = vpop.permute.xlu1 %191 }
 0x200   :  { %v194_v36 = vmul.f32 %v192_v35, %v175_v28 }
 0x202   :  { %v1787_v37 = vpack.c.bf16 %v194_v36, %v194_v36 }
 0x204   :  { %v204_v38 = vunpack.c.l.b16 %v1787_v37 }
 0x206   :  { %v205_v39 = vpack.c.b16 %v204_v38, %v204_v38 }
 0x208   :  { %206 = vrot.lane.b32.xlu1 %v205_v39, %s1685_s20 }
 0x27a   :  { %v207_v40 = vpop.permute.xlu1 %206 }
 0x27b   :  { %1431 = vmatmul.msk.bf16.vlgmr.msrb.gmra.mxu2 %vm140_vm5, %v207_v40 }
 0x27c   :  { %619 = vmatpush.bf16.msrb.mxu2 %v1742_v1  ;;  %v101_v1 = vadd.f32 %v1775_v8, %v1768_v6 }
 0x280   :  { %620 = vmatpush.bf16.msrb.mxu2 %v1754_v4 }
 0x2fe   :  { %v220_v45 = vpop.f32.mrf.mxu2 }
 0x2ff   :  { %v224_v46 = vadd.f32 %v220_v45, %v98_v44 }
 0x301   :  { %1562 = vtanh.f32 %v224_v46  ;;  %v1432_v49 = vmul.f32 -1.442695, %v224_v46 }
 0x303   :  { %1564 = vpow2.f32 %v1432_v49  ;;  %v103_v49 = vadd.f32 %v1775_v8, %v1770_v7 }
 0x306   :  { %v222_v47 = vpop.f32.mrf.mxu2 }
 0x307   :  { %v1563_v48 = vpop.eup %1562 }
 0x308   :  { %247 = vrot.lane.b32.xlu2 %v1563_v48, %s1684_s19 }
 0x309   :  { %v1565_v50 = vpop.eup %1564 }
 0x30a   :  { %v228_v51 = vadd.f32 1.0, %v1565_v50 }
 0x30c   :  { %1566 = vrcp.f32 %v228_v51  ;;  %v240_v57 = vand.u32 2147483648, %v228_v51  ;;  %vm234_vm7 = vweird.f32 %v228_v51  ;;  %v238_v58 = vand.u32 2147483647, %v228_v51 }
 0x30e   :  { %v241_v60 = vor.u32 1.1754944e-38, %v240_v57  ;;  %vm239_vm9 = vcmp.eq.f32.partialorder %v238_v58, 8.507059e+37 }
 0x312   :  { %v1567_v52 = vpop.eup %1566 }
 0x313   :  { %v230_v53 = vmul.f32 %v1567_v52, %v228_v51  ;;  %vm235_vm6 = vweird.f32 %v1567_v52 }
 0x314   :  { %vm236_vm8 = vmor %vm234_vm7, %vm235_vm6 }
 0x315   :  { %v231_v54 = vsub.f32 1.0, %v230_v53 }
 0x317   :  { %v232_v55 = vmul.f32 %v1567_v52, %v231_v54 }
 0x319   :  { %v233_v56 = vadd.f32 %v1567_v52, %v232_v55 }
 0x31b   :  { %v237_v59 = vsel %vm236_vm8, %v1567_v52, %v233_v56 }
 0x31c   :  { %v242_v62 = vsel %vm239_vm9, %v241_v60, %v237_v59 }
 0x31d   :  { %v245_v0 = vmul.f32 %v242_v62, %v188_v32 }
 0x362   :  { %v248_v61 = vpop.permute.xlu2 %247 }
 0x363   :  { %v250_v63 = vmul.f32 %v248_v61, %v242_v62 }
 0x365   :  { %252 = vrot.lane.b32.xlu2 %v250_v63, %s1685_s20 }
 0x3bf   :  { %v253_v2 = vpop.permute.xlu2 %252 }
 0x3c0   :  { %v255_v3 = vadd.f32 %v253_v2, %v245_v0 }
 0x3c2   :  { %1568 = vtanh.f32 %v255_v3 }
 0x3c8   :  { %v1569_v9 = vpop.eup %1568 }
 0x3c9   :  { %258 = vrot.lane.b32.xlu0 %v1569_v9, %s1684_s19 }
 0x43b   :  { %v259_v11 = vpop.permute.xlu0 %258 }
 0x43c   :  { %v261_v12 = vmul.f32 %v259_v11, %v242_v62 }
 0x43e   :  { %v1808_v13 = vpack.c.bf16 %v261_v12, %v261_v12 }
 0x440   :  { %v271_v14 = vunpack.c.l.b16 %v1808_v13 }
 0x442   :  { %v272_v15 = vpack.c.b16 %v271_v14, %v271_v14 }
 0x444   :  { %273 = vrot.lane.b32.xlu1 %v272_v15, %s1685_s20 }
 0x4b6   :  { %v274_v16 = vpop.permute.xlu1 %273 }
 0x4b7   :  { %1433 = vmatmul.msk.bf16.vlgmr.msrb.gmra.mxu3 %vm140_vm5, %v274_v16 }
 0x53a   :  { %v287_v4 = vpop.f32.mrf.mxu3 }
 0x53b   :  { %v291_v19 = vadd.f32 %v287_v4, %v101_v1 }
 0x53d   :  { %1570 = vtanh.f32 %v291_v19  ;;  %v1434_v22 = vmul.f32 -1.442695, %v291_v19 }
 0x53f   :  { %1572 = vpow2.f32 %v1434_v22 }
 0x542   :  { %v289_v20 = vpop.f32.mrf.mxu3 }
 0x543   :  { %v1571_v21 = vpop.eup %1570 }
 0x544   :  { %314 = vrot.lane.b32.xlu2 %v1571_v21, %s1684_s19  ;;  %v106_v21 = vadd.f32 %v1775_v8, %v1794_v41 }
 0x545   :  { %v1573_v23 = vpop.eup %1572 }
 0x546   :  { %v295_v24 = vadd.f32 1.0, %v1573_v23 }
 0x548   :  { %1574 = vrcp.f32 %v295_v24  ;;  %v307_v30 = vand.u32 2147483648, %v295_v24  ;;  %vm301_vm11 = vweird.f32 %v295_v24  ;;  %v305_v6 = vand.u32 2147483647, %v295_v24 }
 0x54a   :  { %v308_v32 = vor.u32 1.1754944e-38, %v307_v30  ;;  %vm306_vm13 = vcmp.eq.f32.partialorder %v305_v6, 8.507059e+37 }
 0x54e   :  { %v1575_v25 = vpop.eup %1574 }
 0x54f   :  { %v297_v26 = vmul.f32 %v1575_v25, %v295_v24  ;;  %vm302_vm10 = vweird.f32 %v1575_v25 }
 0x550   :  { %vm303_vm12 = vmor %vm301_vm11, %vm302_vm10  ;;  %vm200_vm11 = vcmask 257024  }
 0x551   :  { %v298_v27 = vsub.f32 1.0, %v297_v26 }
 0x553   :  { %v299_v28 = vmul.f32 %v1575_v25, %v298_v27 }
 0x555   :  { %v300_v29 = vadd.f32 %v1575_v25, %v299_v28 }
 0x557   :  { %v304_v31 = vsel %vm303_vm12, %v1575_v25, %v300_v29 }
 0x558   :  { %v309_v34 = vsel %vm306_vm13, %v308_v32, %v304_v31 }
 0x559   :  { %v312_v36 = vmul.f32 %v309_v34, %v255_v3 }
 0x59e   :  { %v315_v33 = vpop.permute.xlu2 %314 }
 0x59f   :  { %v317_v35 = vmul.f32 %v315_v33, %v309_v34 }
 0x5a1   :  { %319 = vrot.lane.b32.xlu0 %v317_v35, %s1685_s20 }
 0x613   :  { %v320_v38 = vpop.permute.xlu0 %319 }
 0x614   :  { %v322_v39 = vadd.f32 %v320_v38, %v312_v36 }
 0x616   :  { %1576 = vtanh.f32 %v322_v39 }
 0x61c   :  { %v1577_v40 = vpop.eup %1576 }
 0x61d   :  { %325 = vrot.lane.b32.xlu1 %v1577_v40, %s1684_s19 }
 0x68f   :  { %v326_v43 = vpop.permute.xlu1 %325 }
 0x690   :  { %v328_v44 = vmul.f32 %v326_v43, %v309_v34 }
 0x692   :  { %v1822_v45 = vpack.c.bf16 %v328_v44, %v328_v44 }
 0x694   :  { %v338_v46 = vunpack.c.l.b16 %v1822_v45 }
 0x696   :  { %v339_v47 = vpack.c.b16 %v338_v46, %v338_v46 }
 0x698   :  { %340 = vrot.lane.b32.xlu2 %v339_v47, %s1685_s20 }
 0x6f2   :  { %v341_v48 = vpop.permute.xlu2 %340 }
 0x6f3   :  { %1435 = vmatmul.msk.bf16.vlgmr.msra.gmra.mxu1 %vm140_vm5, %v341_v48 }
 0x770   :  { %v354_v50 = vpop.f32.mrf.mxu1 }
 0x771   :  { %v358_v51 = vadd.f32 %v354_v50, %v103_v49 }
 0x773   :  { %1578 = vtanh.f32 %v358_v51  ;;  %v1436_v54 = vmul.f32 -1.442695, %v358_v51 }
 0x775   :  { %1580 = vpow2.f32 %v1436_v54 }
 0x778   :  { %v356_v52 = vpop.f32.mrf.mxu1 }
 0x779   :  { %v1579_v53 = vpop.eup %1578 }
 0x77a   :  { %381 = vrot.lane.b32.xlu0 %v1579_v53, %s1684_s19  ;;  %v108_v53 = vadd.f32 %v1775_v8, %v1796_v42 }
 0x77b   :  { %v1581_v55 = vpop.eup %1580 }
 0x77c   :  { %v362_v56 = vadd.f32 1.0, %v1581_v55 }
 0x77e   :  { %1582 = vrcp.f32 %v362_v56  ;;  %v374_v62 = vand.u32 2147483648, %v362_v56  ;;  %vm368_vm15 = vweird.f32 %v362_v56  ;;  %v372_v7 = vand.u32 2147483647, %v362_v56 }
 0x780   :  { %v375_v0 = vor.u32 1.1754944e-38, %v374_v62  ;;  %vm373_vm1 = vcmp.eq.f32.partialorder %v372_v7, 8.507059e+37 }
 0x784   :  { %v1583_v57 = vpop.eup %1582 }
 0x785   :  { %v364_v58 = vmul.f32 %v1583_v57, %v362_v56  ;;  %vm369_vm14 = vweird.f32 %v1583_v57 }
 0x786   :  { %vm370_vm0 = vmor %vm368_vm15, %vm369_vm14 }
 0x787   :  { %v365_v59 = vsub.f32 1.0, %v364_v58 }
 0x789   :  { %v366_v60 = vmul.f32 %v1583_v57, %v365_v59 }
 0x78b   :  { %v367_v61 = vadd.f32 %v1583_v57, %v366_v60 }
 0x78d   :  { %v371_v63 = vsel %vm370_vm0, %v1583_v57, %v367_v61 }
 0x78e   :  { %v376_v3 = vsel %vm373_vm1, %v375_v0, %v371_v63 }
 0x78f   :  { %v379_v10 = vmul.f32 %v376_v3, %v322_v39 }
 0x7ec   :  { %v382_v2 = vpop.permute.xlu0 %381 }
 0x7ed   :  { %v384_v9 = vmul.f32 %v382_v2, %v376_v3 }
 0x7ef   :  { %386 = vrot.lane.b32.xlu1 %v384_v9, %s1685_s20 }
 0x861   :  { %v387_v11 = vpop.permute.xlu1 %386 }
 0x862   :  { %v389_v12 = vadd.f32 %v387_v11, %v379_v10 }
 0x864   :  { %1584 = vtanh.f32 %v389_v12 }
 0x86a   :  { %v1585_v14 = vpop.eup %1584 }
 0x86b   :  { %392 = vrot.lane.b32.xlu2 %v1585_v14, %s1684_s19  ;;  %v1536_v14 = vld [vmem:[%s2081_s4 + $0x8] sm:$0xff] }
 0x86c   :  { %737 = vmatpush.bf16.msrb.mxu3 %v1536_v14 }
 0x8c5   :  { %v393_v15 = vpop.permute.xlu2 %392 }
 0x8c6   :  { %v395_v16 = vmul.f32 %v393_v15, %v376_v3  ;;  %v1535_v15 = vld [vmem:[%s2081_s4] sm:$0xff] }
 0x8c7   :  { %738 = vmatpush.bf16.msrb.mxu3 %v1535_v15 }
 0x8c8   :  { %v1832_v1 = vpack.c.bf16 %v395_v16, %v395_v16 }
 0x8ca   :  { %v405_v4 = vunpack.c.l.b16 %v1832_v1 }
 0x8cc   :  { %v406_v19 = vpack.c.b16 %v405_v4, %v405_v4 }
 0x8ce   :  { %407 = vrot.lane.b32.xlu0 %v406_v19, %s1685_s20 }
 0x940   :  { %v408_v20 = vpop.permute.xlu0 %407 }
 0x941   :  { %1437 = vmatmul.msk.bf16.vlgmr.msra.gmra.mxu2 %vm140_vm5, %v408_v20 }
 0x9c4   :  { %v421_v22 = vpop.f32.mrf.mxu2 }
 0x9c5   :  { %v425_v23 = vadd.f32 %v421_v22, %v106_v21 }
 0x9c7   :  { %1586 = vtanh.f32 %v425_v23  ;;  %v1438_v26 = vmul.f32 -1.442695, %v425_v23 }
 0x9c9   :  { %1588 = vpow2.f32 %v1438_v26 }
 0x9cc   :  { %v423_v24 = vpop.f32.mrf.mxu2 }
 0x9cd   :  { %v1587_v25 = vpop.eup %1586 }
 0x9ce   :  { %448 = vrot.lane.b32.xlu1 %v1587_v25, %s1684_s19 }
 0x9cf   :  { %v1589_v27 = vpop.eup %1588 }
 0x9d0   :  { %v429_v28 = vadd.f32 1.0, %v1589_v27  ;;  %v1875_v27 = vld [vmem:[%s2083_s5 + $0x8] sm:$0xff] }
 0x9d1   :  { %791 = vmatpush.bf16.msra.mxu1 %v1875_v27  ;;  %856 = vmatpush.bf16.msra.mxu2 %v1875_v27 }
 0x9d2   :  { %1590 = vrcp.f32 %v429_v28  ;;  %v441_v33 = vand.u32 2147483648, %v429_v28  ;;  %vm435_vm3 = vweird.f32 %v429_v28  ;;  %v439_v41 = vand.u32 2147483647, %v429_v28  ;;  %921 = vmatpush.bf16.msrb.mxu0 %v1875_v27 }
 0x9d4   :  { %v442_v35 = vor.u32 1.1754944e-38, %v441_v33  ;;  %vm440_vm6 = vcmp.eq.f32.partialorder %v439_v41, 8.507059e+37  ;;  %v1902_v41 = vld [vmem:[%s2082_s6] ss:$0 sm:$0xff] }
 0x9d8   :  { %v1591_v29 = vpop.eup %1590 }
 0x9d9   :  { %v431_v30 = vmul.f32 %v1591_v29, %v429_v28  ;;  %vm436_vm2 = vweird.f32 %v1591_v29  ;;  %v1881_v28 = vld [vmem:[%s2083_s5] sm:$0xff] }
 0x9da   :  { %vm437_vm4 = vmor %vm435_vm3, %vm436_vm2  ;;  %792 = vmatpush.bf16.msra.mxu1 %v1881_v28  ;;  %857 = vmatpush.bf16.msra.mxu2 %v1881_v28 }
 0x9db   :  { %v432_v6 = vsub.f32 1.0, %v431_v30  ;;  %922 = vmatpush.bf16.msrb.mxu0 %v1881_v28  ;;  %v111_v30 = vadd.f32 %v1775_v8, %v1813_v17 }
 0x9dd   :  { %v433_v31 = vmul.f32 %v1591_v29, %v432_v6 }
 0x9df   :  { %v434_v32 = vadd.f32 %v1591_v29, %v433_v31  ;;  %1116 = vmatpush.bf16.msra.mxu0 %v1875_v27 }
 0x9e1   :  { %v438_v34 = vsel %vm437_vm4, %v1591_v29, %v434_v32 }
 0x9e2   :  { %v443_v38 = vsel %vm440_vm6, %v442_v35, %v438_v34 }
 0x9e3   :  { %v446_v40 = vmul.f32 %v443_v38, %v389_v12  ;;  %1117 = vmatpush.bf16.msra.mxu0 %v1881_v28 }
 0xa40   :  { %v449_v36 = vpop.permute.xlu1 %448 }
 0xa41   :  { %v451_v39 = vmul.f32 %v449_v36, %v443_v38 }
 0xa43   :  { %453 = vrot.lane.b32.xlu2 %v451_v39, %s1685_s20 }
 0xa9d   :  { %v454_v43 = vpop.permute.xlu2 %453 }
 0xa9e   :  { %v456_v44 = vadd.f32 %v454_v43, %v446_v40 }
 0xaa0   :  { %1592 = vtanh.f32 %v456_v44 }
 0xaa6   :  { %v1593_v46 = vpop.eup %1592 }
 0xaa7   :  { %459 = vrot.lane.b32.xlu0 %v1593_v46, %s1684_s19 }
 0xb19   :  { %v460_v47 = vpop.permute.xlu0 %459 }
 0xb1a   :  { %v462_v48 = vmul.f32 %v460_v47, %v443_v38 }
 0xb1c   :  { %v1842_v49 = vpack.c.bf16 %v462_v48, %v462_v48 }
 0xb1e   :  { %v472_v50 = vunpack.c.l.b16 %v1842_v49 }
 0xb20   :  { %v473_v51 = vpack.c.b16 %v472_v50, %v472_v50 }
 0xb22   :  { %474 = vrot.lane.b32.xlu1 %v473_v51, %s1685_s20 }
 0xb94   :  { %v475_v52 = vpop.permute.xlu1 %474 }
 0xb95   :  { %1439 = vmatmul.msk.bf16.vlgmr.msra.gmra.mxu3 %vm140_vm5, %v475_v52 }
 0xc18   :  { %v488_v54 = vpop.f32.mrf.mxu3 }
 0xc19   :  { %v492_v55 = vadd.f32 %v488_v54, %v108_v53 }
 0xc1b   :  { %1594 = vtanh.f32 %v492_v55  ;;  %v1440_v58 = vmul.f32 -1.442695, %v492_v55 }
 0xc1d   :  { %1596 = vpow2.f32 %v1440_v58 }
 0xc20   :  { %v490_v56 = vpop.f32.mrf.mxu3 }
 0xc21   :  { %v1595_v57 = vpop.eup %1594 }
 0xc22   :  { %515 = vrot.lane.b32.xlu2 %v1595_v57, %s1684_s19 }
 0xc23   :  { %v1597_v59 = vpop.eup %1596 }
 0xc24   :  { %v496_v60 = vadd.f32 1.0, %v1597_v59 }
 0xc26   :  { %1598 = vrcp.f32 %v496_v60  ;;  %v508_v0 = vand.u32 2147483648, %v496_v60  ;;  %vm502_vm8 = vweird.f32 %v496_v60  ;;  %v506_v2 = vand.u32 2147483647, %v496_v60 }
 0xc28   :  { %v509_v9 = vor.u32 1.1754944e-38, %v508_v0  ;;  %vm507_vm10 = vcmp.eq.f32.partialorder %v506_v2, 8.507059e+37 }
 0xc2a   :  { %197 = vrot.lane.b32.xlu2 %v1787_v37, %s1685_s20 }
 0xc2c   :  { %v1599_v61 = vpop.eup %1598 }
 0xc2d   :  { %v498_v62 = vmul.f32 %v1599_v61, %v496_v60  ;;  %vm503_vm7 = vweird.f32 %v1599_v61 }
 0xc2e   :  { %vm504_vm9 = vmor %vm502_vm8, %vm503_vm7 }
 0xc2f   :  { %v499_v7 = vsub.f32 1.0, %v498_v62 }
 0xc31   :  { %v500_v63 = vmul.f32 %v1599_v61, %v499_v7 }
 0xc33   :  { %v501_v42 = vadd.f32 %v1599_v61, %v500_v63 }
 0xc35   :  { %v505_v3 = vsel %vm504_vm9, %v1599_v61, %v501_v42 }
 0xc36   :  { %v510_v37 = vsel %vm507_vm10, %v509_v9, %v505_v3 }
 0xc37   :  { %v513_v16 = vmul.f32 %v510_v37, %v456_v44 }
 0xc7c   :  { %v516_v10 = vpop.permute.xlu2 %515 }
 0xc7d   :  { %v518_v11 = vmul.f32 %v516_v10, %v510_v37 }
 0xc7f   :  { %520 = vrot.lane.b32.xlu0 %v518_v11, %s1685_s20 }
 0xc84   :  { %v198_v12 = vpop.permute.xlu2 %197 }
 0xc85   :  { %201 = vst.msk [vmem:[#allocation3] sm:$0xf] %vm200_vm11, %v198_v12 }
 0xc87   :  { %264 = vrot.lane.b32.xlu0 %v1808_v13, %s1685_s20 }
 0xcf1   :  { %v521_v4 = vpop.permute.xlu0 %520 }
 0xcf2   :  { %v1862_v19 = vadd.f32 %v521_v4, %v513_v16 }
 0xcf4   :  { %1600 = vtanh.f32 %v1862_v19 }
 0xcf9   :  { %v265_v20 = vpop.permute.xlu0 %264 }
 0xcfa   :  { %v1601_v21 = vpop.eup %1600  ;;  %268 = vst.msk [vmem:[#allocation3 + $0x4] sm:$0xf] %vm200_vm11, %v265_v20 }
 0xcfb   :  { %526 = vrot.lane.b32.xlu1 %v1601_v21, %s1684_s19 }
 0xd01   :  { %v1531_v13 = vld [vmem:[#allocation3] sm:$0xff] }
 0xd02   :  { %1469 = vmatmul.msk.bf16.vlgmr.msrb.gmra.mxu3 %vm140_vm5, %v1531_v13 }
 0xd6d   :  { %v527_v22 = vpop.permute.xlu1 %526 }
 0xd6e   :  { %v529_v23 = vmul.f32 %v527_v22, %v510_v37 }
 0xd70   :  { %v1868_v24 = vpack.c.bf16 %v529_v23, %v529_v23 }
 0xd72   :  { %v539_v25 = vunpack.c.l.b16 %v1868_v24 }
 0xd74   :  { %v540_v26 = vpack.c.b16 %v539_v25, %v539_v25 }
 0xd76   :  { %541 = vrot.lane.b32.xlu1 %v540_v26, %s1685_s20 }
 0xde8   :  { %v542_v29 = vpop.permute.xlu1 %541 }
 0xde9   :  { %1441 = vmatmul.msk.bf16.vlgmr.msrb.gmra.mxu1 %vm140_vm5, %v542_v29 }
 0xdea   :  { %986 = vmatpush.bf16.msrb.mxu1 %v1875_v27 }
 0xdee   :  { %987 = vmatpush.bf16.msrb.mxu1 %v1881_v28 }
 0xdf9   :  { %793 = vmatmul.bf16.vlgmr.msra.gmra.mxu1 %v1683_v5  ;;  %v740_v5 = vpop.f32.mrf.mxu3 }
 0xdfa   :  { %1181 = vmatpush.bf16.msra.mxu1 %v1875_v27  ;;  %v741_v34 = vadd.f32 %v1902_v41, %v740_v5 }
 0xdfe   :  { %1182 = vmatpush.bf16.msra.mxu1 %v1881_v28 }
 0xe66   :  { %v555_v6 = vpop.f32.mrf.mxu1 }
 0xe67   :  { %v559_v31 = vadd.f32 %v555_v6, %v111_v30 }
 0xe69   :  { %1602 = vtanh.f32 %v559_v31  ;;  %v1442_v17 = vmul.f32 -1.442695, %v559_v31 }
 0xe6e   :  { %v557_v32 = vpop.f32.mrf.mxu1 }
 0xe6f   :  { %v1603_v33 = vpop.eup %1602 }
 0xe70   :  { %582 = vrot.lane.b32.xlu2 %v1603_v33, %s1684_s19 }
 0xe76   :  { %v794_v35 = vpop.f32.mrf.mxu1 }
 0xe77   :  { %v798_v36 = vadd.f32 %v794_v35, %v741_v34  ;;  %v742_v35 = vpop.f32.mrf.mxu3 }
 0xe79   :  { %1604 = vtanh.f32 %v798_v36  ;;  %v1481_v51 = vmul.f32 -1.442695, %v798_v36  ;;  %v743_v36 = vadd.f32 %v1902_v41, %v742_v35 }
 0xe7a   :  { %1606 = vpow2.f32 %v1442_v17 }
 0xe7e   :  { %v796_v38 = vpop.f32.mrf.mxu1 }
 0xe7f   :  { %v1605_v8 = vpop.eup %1604 }
 0xe80   :  { %821 = vrot.lane.b32.xlu0 %v1605_v8, %s1684_s19  ;;  %v1607_v39 = vpop.eup %1606 }
 0xe81   :  { %v563_v40 = vadd.f32 1.0, %v1607_v39 }
 0xe83   :  { %1608 = vrcp.f32 %v563_v40  ;;  %v575_v50 = vand.u32 2147483648, %v563_v40  ;;  %vm569_vm13 = vweird.f32 %v563_v40  ;;  %v573_v52 = vand.u32 2147483647, %v563_v40 }
 0xe84   :  { %1610 = vpow2.f32 %v1481_v51 }
 0xe85   :  { %v576_v54 = vor.u32 1.1754944e-38, %v575_v50  ;;  %vm574_vm15 = vcmp.eq.f32.partialorder %v573_v52, 8.507059e+37 }
 0xe89   :  { %v1609_v43 = vpop.eup %1608 }
 0xe8a   :  { %v565_v44 = vmul.f32 %v1609_v43, %v563_v40  ;;  %vm570_vm12 = vweird.f32 %v1609_v43  ;;  %v1611_v58 = vpop.eup %1610 }
 0xe8b   :  { %vm571_vm14 = vmor %vm569_vm13, %vm570_vm12  ;;  %v802_v59 = vadd.f32 1.0, %v1611_v58 }
 0xe8c   :  { %v566_v46 = vsub.f32 1.0, %v565_v44 }
 0xe8d   :  { %1612 = vrcp.f32 %v802_v59  ;;  %v814_v42 = vand.u32 2147483648, %v802_v59  ;;  %vm808_vm1 = vweird.f32 %v802_v59  ;;  %v812_v0 = vand.u32 2147483647, %v802_v59 }
 0xe8e   :  { %v567_v47 = vmul.f32 %v1609_v43, %v566_v46 }
 0xe8f   :  { %v815_v3 = vor.u32 1.1754944e-38, %v814_v42  ;;  %vm813_vm3 = vcmp.eq.f32.partialorder %v812_v0, 8.507059e+37 }
 0xe90   :  { %v568_v48 = vadd.f32 %v1609_v43, %v567_v47 }
 0xe92   :  { %v572_v53 = vsel %vm571_vm14, %v1609_v43, %v568_v48 }
 0xe93   :  { %v577_v56 = vsel %vm574_vm15, %v576_v54, %v572_v53  ;;  %v1613_v60 = vpop.eup %1612 }
 0xe94   :  { %v804_v61 = vmul.f32 %v1613_v60, %v802_v59  ;;  %vm809_vm0 = vweird.f32 %v1613_v60  ;;  %v580_v11 = vmul.f32 %v577_v56, %v1862_v19 }
 0xe95   :  { %vm810_vm2 = vmor %vm808_vm1, %vm809_vm0 }
 0xe96   :  { %v805_v62 = vsub.f32 1.0, %v804_v61 }
 0xe98   :  { %v806_v7 = vmul.f32 %v1613_v60, %v805_v62 }
 0xe9a   :  { %v807_v63 = vadd.f32 %v1613_v60, %v806_v7 }
 0xe9c   :  { %v811_v2 = vsel %vm810_vm2, %v1613_v60, %v807_v63 }
 0xe9d   :  { %v816_v10 = vsel %vm813_vm3, %v815_v3, %v811_v2 }
 0xe9e   :  { %v819_v16 = vmul.f32 0.0, %v816_v10 }
 0xeca   :  { %v583_v55 = vpop.permute.xlu2 %582 }
 0xecb   :  { %v585_v57 = vmul.f32 %v583_v55, %v577_v56 }
 0xecd   :  { %587 = vrot.lane.b32.xlu1 %v585_v57, %s1685_s20 }
 0xef2   :  { %v822_v9 = vpop.permute.xlu0 %821 }
 0xef3   :  { %v824_v37 = vmul.f32 %v822_v9, %v816_v10 }
 0xef5   :  { %826 = vrot.lane.b32.xlu2 %v824_v37, %s1685_s20 }
 0xf3f   :  { %v588_v12 = vpop.permute.xlu1 %587 }
 0xf40   :  { %v1909_v14 = vadd.f32 %v588_v12, %v580_v11 }
 0xf42   :  { %1614 = vtanh.f32 %v1909_v14 }
 0xf48   :  { %v1615_v15 = vpop.eup %1614 }
 0xf49   :  { %593 = vrot.lane.b32.xlu0 %v1615_v15, %s1684_s19 }
 0xf4f   :  { %v827_v4 = vpop.permute.xlu2 %826 }
 0xf50   :  { %v829_v20 = vadd.f32 %v827_v4, %v819_v16 }
 0xf52   :  { %1616 = vtanh.f32 %v829_v20 }
 0xf58   :  { %v1617_v21 = vpop.eup %1616 }
 0xf59   :  { %832 = vrot.lane.b32.xlu1 %v1617_v21, %s1684_s19 }
 0xfbb   :  { %v594_v13 = vpop.permute.xlu0 %593 }
 0xfbc   :  { %v596_v22 = vmul.f32 %v594_v13, %v577_v56 }
 0xfbe   :  { %v1914_v23 = vpack.c.bf16 %v596_v22, %v596_v22 }
 0xfc0   :  { %v606_v19 = vunpack.c.l.b16 %v1914_v23 }
 0xfc2   :  { %v607_v25 = vpack.c.b16 %v606_v19, %v606_v19 }
 0xfc4   :  { %608 = vrot.lane.b32.xlu2 %v607_v25, %s1685_s20 }
 0xfcb   :  { %v833_v26 = vpop.permute.xlu1 %832 }
 0xfcc   :  { %v835_v29 = vmul.f32 %v833_v26, %v816_v10 }
 0xfce   :  { %v1918_v30 = vpack.c.bf16 %v835_v29, %v835_v29 }
 0xfd0   :  { %v843_v6 = vunpack.c.l.b16 %v1918_v30 }
 0xfd2   :  { %v844_v31 = vpack.c.b16 %v843_v6, %v843_v6 }
 0xfd4   :  { %845 = vrot.lane.b32.xlu0 %v844_v31, %s1685_s20 }
0x101e   :  { %v609_v32 = vpop.permute.xlu2 %608 }
0x101f   :  { %1443 = vmatmul.msk.bf16.vlgmr.msrb.gmra.mxu2 %vm140_vm5, %v609_v32 }
0x1020   :  { %1051 = vmatpush.bf16.msrb.mxu2 %v1875_v27 }
0x1024   :  { %1052 = vmatpush.bf16.msrb.mxu2 %v1881_v28 }
0x1046   :  { %v846_v33 = vpop.permute.xlu0 %845 }
0x1047   :  { %1482 = vmatmul.msk.bf16.vlgmr.msra.gmra.mxu2 %vm140_vm5, %v846_v33 }
0x1048   :  { %1246 = vmatpush.bf16.msra.mxu2 %v1875_v27 }
0x104c   :  { %1247 = vmatpush.bf16.msra.mxu2 %v1881_v28 }
0x10a2   :  { %v1928_v5 = vpop.f32.mrf.mxu2 }
0x10aa   :  { %v624_v34 = vpop.f32.mrf.mxu2 }
0x10ca   :  { %v859_v38 = vpop.f32.mrf.mxu2 }
0x10cb   :  { %v863_v8 = vadd.f32 %v859_v38, %v743_v36 }
0x10cd   :  { %1618 = vtanh.f32 %v863_v8  ;;  %v1483_v40 = vmul.f32 -1.442695, %v863_v8 }
0x10cf   :  { %1620 = vpow2.f32 %v1483_v40 }
0x10d2   :  { %v861_v17 = vpop.f32.mrf.mxu2 }
0x10d3   :  { %v1619_v39 = vpop.eup %1618 }
0x10d4   :  { %886 = vrot.lane.b32.xlu1 %v1619_v39, %s1684_s19 }
0x10d5   :  { %v1621_v27 = vpop.eup %1620 }
0x10d6   :  { %v867_v28 = vadd.f32 1.0, %v1621_v27 }
0x10d8   :  { %1622 = vrcp.f32 %v867_v28  ;;  %v879_v50 = vand.u32 2147483648, %v867_v28  ;;  %vm873_vm6 = vweird.f32 %v867_v28  ;;  %v877_v51 = vand.u32 2147483647, %v867_v28 }
0x10da   :  { %v880_v53 = vor.u32 1.1754944e-38, %v879_v50  ;;  %vm878_vm8 = vcmp.eq.f32.partialorder %v877_v51, 8.507059e+37 }
0x10dc   :  { %331 = vrot.lane.b32.xlu1 %v1822_v45, %s1685_s20 }
0x10de   :  { %v1623_v43 = vpop.eup %1622 }
0x10df   :  { %v869_v44 = vmul.f32 %v1623_v43, %v867_v28  ;;  %vm874_vm4 = vweird.f32 %v1623_v43 }
0x10e0   :  { %vm875_vm7 = vmor %vm873_vm6, %vm874_vm4 }
0x10e1   :  { %v870_v46 = vsub.f32 1.0, %v869_v44 }
0x10e3   :  { %v871_v47 = vmul.f32 %v1623_v43, %v870_v46 }
0x10e5   :  { %v872_v48 = vadd.f32 %v1623_v43, %v871_v47 }
0x10e7   :  { %v876_v52 = vsel %vm875_vm7, %v1623_v43, %v872_v48 }
0x10e8   :  { %v881_v45 = vsel %vm878_vm8, %v880_v53, %v876_v52 }
0x10e9   :  { %v884_v57 = vmul.f32 %v881_v45, %v829_v20 }
0x1146   :  { %v887_v54 = vpop.permute.xlu1 %886 }
0x1147   :  { %v889_v55 = vmul.f32 %v887_v54, %v881_v45 }
0x1149   :  { %891 = vrot.lane.b32.xlu2 %v889_v55, %s1685_s20 }
0x114e   :  { %v332_v56 = vpop.permute.xlu1 %331 }
0x114f   :  { %335 = vst.msk [vmem:[#allocation3 + $0x8] sm:$0xf] %vm200_vm11, %v332_v56 }
0x1151   :  { %398 = vrot.lane.b32.xlu2 %v1832_v1, %s1685_s20 }
0x11a3   :  { %v892_v58 = vpop.permute.xlu2 %891 }
0x11a4   :  { %v894_v59 = vadd.f32 %v892_v58, %v884_v57 }
0x11a6   :  { %1624 = vtanh.f32 %v894_v59 }
0x11ab   :  { %v399_v60 = vpop.permute.xlu2 %398 }
0x11ac   :  { %v1625_v61 = vpop.eup %1624  ;;  %402 = vst.msk [vmem:[#allocation3 + $0xc] sm:$0xf] %vm200_vm11, %v399_v60 }
0x11ad   :  { %897 = vrot.lane.b32.xlu0 %v1625_v61, %s1684_s19 }
0x11b3   :  { %v1532_v62 = vld [vmem:[#allocation3 + $0x8] sm:$0xff] }
0x11b4   :  { %1470 = vmatmul.msk.bf16.gmra.mxu3 %vm140_vm5, %v1532_v62 }
0x121f   :  { %v898_v7 = vpop.permute.xlu0 %897 }
0x1220   :  { %v900_v63 = vmul.f32 %v898_v7, %v881_v45 }
0x1222   :  { %v1941_v42 = vpack.c.bf16 %v900_v63, %v900_v63 }
0x1224   :  { %v908_v0 = vunpack.c.l.b16 %v1941_v42 }
0x1226   :  { %v909_v1 = vpack.c.b16 %v908_v0, %v908_v0 }
0x1228   :  { %910 = vrot.lane.b32.xlu0 %v909_v1, %s1685_s20 }
0x1237   :  { %v745_v3 = vpop.f32.mrf.mxu3 }
0x1238   :  { %v746_v9 = vadd.f32 %v1902_v41, %v745_v3 }
0x123f   :  { %v747_v43 = vpop.f32.mrf.mxu3 }
0x1240   :  { %v748_v44 = vadd.f32 %v1902_v41, %v747_v43 }
0x129a   :  { %v911_v2 = vpop.permute.xlu0 %910 }
0x129b   :  { %1484 = vmatmul.msk.bf16.vlgmr.msrb.gmra.mxu0 %vm140_vm5, %v911_v2 }
0x1318   :  { %v924_v10 = vpop.f32.mrf.mxu0 }
0x1319   :  { %v928_v37 = vadd.f32 %v924_v10, %v746_v9 }
0x131b   :  { %1626 = vtanh.f32 %v928_v37  ;;  %v1485_v15 = vmul.f32 -1.442695, %v928_v37 }
0x131d   :  { %1628 = vpow2.f32 %v1485_v15 }
0x1320   :  { %v926_v11 = vpop.f32.mrf.mxu0 }
0x1321   :  { %v1627_v12 = vpop.eup %1626 }
0x1322   :  { %951 = vrot.lane.b32.xlu1 %v1627_v12, %s1684_s19 }
0x1323   :  { %v1629_v16 = vpop.eup %1628 }
0x1324   :  { %v932_v4 = vadd.f32 1.0, %v1629_v16 }
0x1326   :  { %1630 = vrcp.f32 %v932_v4  ;;  %v944_v25 = vand.u32 2147483648, %v932_v4  ;;  %vm938_vm10 = vweird.f32 %v932_v4  ;;  %v942_v26 = vand.u32 2147483647, %v932_v4 }
0x1328   :  { %v945_v6 = vor.u32 1.1754944e-38, %v944_v25  ;;  %vm943_vm13 = vcmp.eq.f32.partialorder %v942_v26, 8.507059e+37 }
0x132c   :  { %v1631_v20 = vpop.eup %1630 }
0x132d   :  { %v934_v21 = vmul.f32 %v1631_v20, %v932_v4  ;;  %vm939_vm9 = vweird.f32 %v1631_v20 }
0x132e   :  { %vm940_vm12 = vmor %vm938_vm10, %vm939_vm9 }
0x132f   :  { %v935_v13 = vsub.f32 1.0, %v934_v21 }
0x1331   :  { %v936_v22 = vmul.f32 %v1631_v20, %v935_v13 }
0x1333   :  { %v937_v19 = vadd.f32 %v1631_v20, %v936_v22 }
0x1335   :  { %v941_v29 = vsel %vm940_vm12, %v1631_v20, %v937_v19 }
0x1336   :  { %v946_v32 = vsel %vm943_vm13, %v945_v6, %v941_v29 }
0x1337   :  { %v949_v34 = vmul.f32 %v946_v32, %v894_v59 }
0x1394   :  { %v952_v31 = vpop.permute.xlu1 %951 }
0x1395   :  { %v954_v33 = vmul.f32 %v952_v31, %v946_v32 }
0x1397   :  { %956 = vrot.lane.b32.xlu2 %v954_v33, %s1685_s20 }
0x13f1   :  { %v957_v35 = vpop.permute.xlu2 %956 }
0x13f2   :  { %v959_v36 = vadd.f32 %v957_v35, %v949_v34 }
0x13f4   :  { %1632 = vtanh.f32 %v959_v36 }
0x13fa   :  { %v1633_v38 = vpop.eup %1632 }
0x13fb   :  { %962 = vrot.lane.b32.xlu0 %v1633_v38, %s1684_s19 }
0x146d   :  { %v963_v8 = vpop.permute.xlu0 %962 }
0x146e   :  { %v965_v17 = vmul.f32 %v963_v8, %v946_v32  ;;  %v1682_v8 = vld [vmem:[%s2080_s3] ss:$0 sm:$0xff] }
0x1470   :  { %v1950_v39 = vpack.c.bf16 %v965_v17, %v965_v17  ;;  %v113_v17 = vadd.f32 %v1682_v8, %v1815_v18 }
0x1472   :  { %v973_v40 = vunpack.c.l.b16 %v1950_v39 }
0x1474   :  { %v974_v27 = vpack.c.b16 %v973_v40, %v973_v40 }
0x1476   :  { %975 = vrot.lane.b32.xlu1 %v974_v27, %s1685_s20  ;;  %v626_v27 = vadd.f32 %v1928_v5, %v113_v17 }
0x14e8   :  { %v976_v28 = vpop.permute.xlu1 %975 }
0x14e9   :  { %1486 = vmatmul.msk.bf16.vlgmr.msrb.gmra.mxu1 %vm140_vm5, %v976_v28 }
0x1566   :  { %v989_v46 = vpop.f32.mrf.mxu1 }
0x1567   :  { %v993_v47 = vadd.f32 %v989_v46, %v748_v44 }
0x1569   :  { %1634 = vtanh.f32 %v993_v47  ;;  %v1487_v51 = vmul.f32 -1.442695, %v993_v47 }
0x156b   :  { %1636 = vpow2.f32 %v1487_v51  ;;  %v1444_v51 = vmul.f32 -1.442695, %v626_v27 }
0x156e   :  { %v991_v48 = vpop.f32.mrf.mxu1 }
0x156f   :  { %v1635_v50 = vpop.eup %1634 }
0x1570   :  { %1016 = vrot.lane.b32.xlu2 %v1635_v50, %s1684_s19 }
0x1571   :  { %v1637_v52 = vpop.eup %1636 }
0x1572   :  { %v997_v53 = vadd.f32 1.0, %v1637_v52 }
0x1574   :  { %1638 = vrcp.f32 %v997_v53  ;;  %v1009_v58 = vand.u32 2147483648, %v997_v53  ;;  %vm1003_vm15 = vweird.f32 %v997_v53  ;;  %v1007_v59 = vand.u32 2147483647, %v997_v53 }
0x1576   :  { %v1010_v61 = vor.u32 1.1754944e-38, %v1009_v58  ;;  %vm1008_vm1 = vcmp.eq.f32.partialorder %v1007_v59, 8.507059e+37 }
0x1578   :  { %465 = vrot.lane.b32.xlu2 %v1842_v49, %s1685_s20 }
0x157a   :  { %v1639_v54 = vpop.eup %1638 }
0x157b   :  { %v999_v45 = vmul.f32 %v1639_v54, %v997_v53  ;;  %vm1004_vm14 = vweird.f32 %v1639_v54 }
0x157c   :  { %vm1005_vm0 = vmor %vm1003_vm15, %vm1004_vm14 }
0x157d   :  { %v1000_v55 = vsub.f32 1.0, %v999_v45 }
0x157f   :  { %v1001_v56 = vmul.f32 %v1639_v54, %v1000_v55 }
0x1581   :  { %v1002_v57 = vadd.f32 %v1639_v54, %v1001_v56 }
0x1583   :  { %v1006_v60 = vsel %vm1005_vm0, %v1639_v54, %v1002_v57 }
0x1584   :  { %v1011_v49 = vsel %vm1008_vm1, %v1010_v61, %v1006_v60 }
0x1585   :  { %v1014_v0 = vmul.f32 %v1011_v49, %v959_v36 }
0x15ca   :  { %v1017_v62 = vpop.permute.xlu2 %1016 }
0x15cb   :  { %v1019_v7 = vmul.f32 %v1017_v62, %v1011_v49 }
0x15cd   :  { %1021 = vrot.lane.b32.xlu0 %v1019_v7, %s1685_s20 }
0x15d2   :  { %v466_v63 = vpop.permute.xlu2 %465 }
0x15d3   :  { %469 = vst.msk [vmem:[#allocation3 + $0x10] sm:$0xf] %vm200_vm11, %v466_v63 }
0x15d5   :  { %532 = vrot.lane.b32.xlu0 %v1868_v24, %s1685_s20 }
0x163f   :  { %v1022_v1 = vpop.permute.xlu0 %1021 }
0x1640   :  { %v1024_v2 = vadd.f32 %v1022_v1, %v1014_v0 }
0x1642   :  { %1640 = vtanh.f32 %v1024_v2 }
0x1647   :  { %v533_v3 = vpop.permute.xlu0 %532 }
0x1648   :  { %v1641_v9 = vpop.eup %1640  ;;  %536 = vst.msk [vmem:[#allocation3 + $0x14] sm:$0xf] %vm200_vm11, %v533_v3 }
0x1649   :  { %1027 = vrot.lane.b32.xlu1 %v1641_v9, %s1684_s19 }
0x164f   :  { %v1533_v10 = vld [vmem:[#allocation3 + $0x10] sm:$0xff] }
0x1650   :  { %1471 = vmatmul.msk.bf16.gmra.mxu3 %vm140_vm5, %v1533_v10 }
0x16bb   :  { %v1028_v37 = vpop.permute.xlu1 %1027 }
0x16bc   :  { %v1030_v11 = vmul.f32 %v1028_v37, %v1011_v49 }
0x16be   :  { %v1966_v12 = vpack.c.bf16 %v1030_v11, %v1030_v11 }
0x16c0   :  { %v1038_v15 = vunpack.c.l.b16 %v1966_v12 }
0x16c2   :  { %v1039_v24 = vpack.c.b16 %v1038_v15, %v1038_v15 }
0x16c4   :  { %1040 = vrot.lane.b32.xlu1 %v1039_v24, %s1685_s20 }
0x16d3   :  { %v750_v4 = vpop.f32.mrf.mxu3 }
0x16d4   :  { %v751_v20 = vadd.f32 %v1902_v41, %v750_v4 }
0x16db   :  { %v752_v9 = vpop.f32.mrf.mxu3 }
0x16dc   :  { %v753_v10 = vadd.f32 %v1902_v41, %v752_v9 }
0x1736   :  { %v1041_v16 = vpop.permute.xlu1 %1040 }
0x1737   :  { %1488 = vmatmul.msk.bf16.vlgmr.msrb.gmra.mxu2 %vm140_vm5, %v1041_v16 }
0x17ba   :  { %v1054_v21 = vpop.f32.mrf.mxu2 }
0x17bb   :  { %v1058_v13 = vadd.f32 %v1054_v21, %v751_v20 }
0x17bd   :  { %1642 = vtanh.f32 %v1058_v13  ;;  %v1489_v25 = vmul.f32 -1.442695, %v1058_v13 }
0x17bf   :  { %1644 = vpow2.f32 %v1489_v25 }
0x17c2   :  { %v1056_v22 = vpop.f32.mrf.mxu2 }
0x17c3   :  { %v1643_v19 = vpop.eup %1642 }
0x17c4   :  { %1081 = vrot.lane.b32.xlu2 %v1643_v19, %s1684_s19 }
0x17c5   :  { %v1645_v26 = vpop.eup %1644 }
0x17c6   :  { %v1062_v29 = vadd.f32 1.0, %v1645_v26 }
0x17c8   :  { %1646 = vrcp.f32 %v1062_v29  ;;  %v1074_v35 = vand.u32 2147483648, %v1062_v29  ;;  %vm1068_vm3 = vweird.f32 %v1062_v29  ;;  %v1072_v36 = vand.u32 2147483647, %v1062_v29 }
0x17c9   :  { %1648 = vtanh.f32 %v626_v27 }
0x17ca   :  { %v1075_v40 = vor.u32 1.1754944e-38, %v1074_v35  ;;  %vm1073_vm6 = vcmp.eq.f32.partialorder %v1072_v36, 8.507059e+37 }
0x17ce   :  { %v1647_v6 = vpop.eup %1646 }
0x17cf   :  { %v1064_v31 = vmul.f32 %v1647_v6, %v1062_v29  ;;  %vm1069_vm2 = vweird.f32 %v1647_v6  ;;  %v1649_v46 = vpop.eup %1648 }
0x17d0   :  { %vm1070_vm4 = vmor %vm1068_vm3, %vm1069_vm2 }
0x17d1   :  { %v1065_v32 = vsub.f32 1.0, %v1064_v31 }
0x17d3   :  { %v1066_v33 = vmul.f32 %v1647_v6, %v1065_v32 }
0x17d5   :  { %v1067_v34 = vadd.f32 %v1647_v6, %v1066_v33 }
0x17d7   :  { %v1071_v38 = vsel %vm1070_vm4, %v1647_v6, %v1067_v34 }
0x17d8   :  { %v1076_v43 = vsel %vm1073_vm6, %v1075_v40, %v1071_v38 }
0x17d9   :  { %v1079_v47 = vmul.f32 %v1076_v43, %v1024_v2 }
0x181e   :  { %v1082_v28 = vpop.permute.xlu2 %1081 }
0x181f   :  { %v1084_v44 = vmul.f32 %v1082_v28, %v1076_v43 }
0x1821   :  { %1086 = vrot.lane.b32.xlu0 %v1084_v44, %s1685_s20 }
0x1829   :  { %649 = vrot.lane.b32.xlu0 %v1649_v46, %s1684_s19 }
0x1893   :  { %v1087_v48 = vpop.permute.xlu0 %1086 }
0x1894   :  { %v1980_v50 = vadd.f32 %v1087_v48, %v1079_v47 }
0x1896   :  { %1650 = vtanh.f32 %v1980_v50 }
0x1897   :  { %1652 = vpow2.f32 %v1444_v51 }
0x189b   :  { %v650_v0 = vpop.permute.xlu0 %649 }
0x189c   :  { %v1651_v18 = vpop.eup %1650 }
0x189d   :  { %1092 = vrot.lane.b32.xlu1 %v1651_v18, %s1684_s19  ;;  %v1653_v5 = vpop.eup %1652 }
0x189e   :  { %v630_v52 = vadd.f32 1.0, %v1653_v5 }
0x18a0   :  { %1654 = vrcp.f32 %v630_v52  ;;  %v642_v62 = vand.u32 2147483648, %v630_v52  ;;  %vm636_vm8 = vweird.f32 %v630_v52  ;;  %v640_v49 = vand.u32 2147483647, %v630_v52 }
0x18a2   :  { %v643_v63 = vor.u32 1.1754944e-38, %v642_v62  ;;  %vm641_vm10 = vcmp.eq.f32.partialorder %v640_v49, 8.507059e+37 }
0x18a6   :  { %v1655_v53 = vpop.eup %1654 }
0x18a7   :  { %v632_v54 = vmul.f32 %v1655_v53, %v630_v52  ;;  %vm637_vm7 = vweird.f32 %v1655_v53 }
0x18a8   :  { %vm638_vm9 = vmor %vm636_vm8, %vm637_vm7 }
0x18a9   :  { %v633_v45 = vsub.f32 1.0, %v632_v54 }
0x18ab   :  { %v634_v57 = vmul.f32 %v1655_v53, %v633_v45 }
0x18ad   :  { %v635_v60 = vadd.f32 %v1655_v53, %v634_v57 }
0x18af   :  { %v639_v7 = vsel %vm638_vm9, %v1655_v53, %v635_v60 }
0x18b0   :  { %v644_v1 = vsel %vm641_vm10, %v643_v63, %v639_v7 }
0x18b1   :  { %v652_v2 = vmul.f32 %v650_v0, %v644_v1  ;;  %v647_v24 = vmul.f32 %v644_v1, %v1909_v14 }
0x190f   :  { %v1093_v55 = vpop.permute.xlu1 %1092 }
0x1910   :  { %v1095_v56 = vmul.f32 %v1093_v55, %v1076_v43 }
0x1912   :  { %v1984_v58 = vpack.c.bf16 %v1095_v56, %v1095_v56 }
0x1914   :  { %v1103_v59 = vunpack.c.l.b16 %v1984_v58 }
0x1916   :  { %v1104_v61 = vpack.c.b16 %v1103_v59, %v1103_v59 }
0x1918   :  { %1105 = vrot.lane.b32.xlu2 %v1104_v61, %s1685_s20 }
0x1920   :  { %654 = vrot.lane.b32.xlu2 %v652_v2, %s1685_s20 }
0x1972   :  { %v1106_v3 = vpop.permute.xlu2 %1105 }
0x1973   :  { %1490 = vmatmul.msk.bf16.vlgmr.msra.gmra.mxu0 %vm140_vm5, %v1106_v3 }
0x197a   :  { %v655_v15 = vpop.permute.xlu2 %654 }
0x197b   :  { %v657_v16 = vadd.f32 %v655_v15, %v647_v24 }
0x19f0   :  { %v1119_v37 = vpop.f32.mrf.mxu0 }
0x19f1   :  { %v1123_v11 = vadd.f32 %v1119_v37, %v753_v10 }
0x19f3   :  { %1656 = vtanh.f32 %v1123_v11  ;;  %v1491_v13 = vmul.f32 -1.442695, %v1123_v11 }
0x19f4   :  { %1658 = vtanh.f32 %v657_v16 }
0x19f5   :  { %1660 = vpow2.f32 %v1491_v13 }
0x19f8   :  { %v1121_v4 = vpop.f32.mrf.mxu0 }
0x19f9   :  { %v1657_v20 = vpop.eup %1656 }
0x19fa   :  { %1146 = vrot.lane.b32.xlu1 %v1657_v20, %s1684_s19  ;;  %v1659_v21 = vpop.eup %1658 }
0x19fb   :  { %v1661_v22 = vpop.eup %1660 }
0x19fc   :  { %v1127_v19 = vadd.f32 1.0, %v1661_v22 }
0x19fe   :  { %1662 = vrcp.f32 %v1127_v19  ;;  %v1139_v14 = vand.u32 2147483648, %v1127_v19  ;;  %vm1133_vm13 = vweird.f32 %v1127_v19  ;;  %v1137_v32 = vand.u32 2147483647, %v1127_v19 }
0x1a00   :  { %v1140_v34 = vor.u32 1.1754944e-38, %v1139_v14  ;;  %vm1138_vm15 = vcmp.eq.f32.partialorder %v1137_v32, 8.507059e+37 }
0x1a02   :  { %660 = vrot.lane.b32.xlu1 %v1659_v21, %s1684_s19 }
0x1a04   :  { %v1663_v25 = vpop.eup %1662 }
0x1a05   :  { %v1129_v26 = vmul.f32 %v1663_v25, %v1127_v19  ;;  %vm1134_vm12 = vweird.f32 %v1663_v25 }
0x1a06   :  { %vm1135_vm14 = vmor %vm1133_vm13, %vm1134_vm12 }
0x1a07   :  { %v1130_v29 = vsub.f32 1.0, %v1129_v26 }
0x1a09   :  { %v1131_v6 = vmul.f32 %v1663_v25, %v1130_v29 }
0x1a0b   :  { %v1132_v31 = vadd.f32 %v1663_v25, %v1131_v6 }
0x1a0d   :  { %v1136_v33 = vsel %vm1135_vm14, %v1663_v25, %v1132_v31 }
0x1a0e   :  { %v1141_v36 = vsel %vm1138_vm15, %v1140_v34, %v1136_v33 }
0x1a0f   :  { %v1144_v27 = vmul.f32 %v1141_v36, %v1980_v50 }
0x1a6c   :  { %v1147_v35 = vpop.permute.xlu1 %1146 }
0x1a6d   :  { %v1149_v38 = vmul.f32 %v1147_v35, %v1141_v36 }
0x1a6f   :  { %1151 = vrot.lane.b32.xlu0 %v1149_v38, %s1685_s20 }
0x1a74   :  { %v661_v8 = vpop.permute.xlu1 %660 }
0x1a75   :  { %v663_v17 = vmul.f32 %v661_v8, %v644_v1 }
0x1a77   :  { %v664_v40 = vpack.c.bf16 %v663_v17, %v663_v17  ;;  %599 = vrot.lane.b32.xlu0 %v1914_v23, %s1685_s20 }
0x1a79   :  { %666 = vrot.lane.b32.xlu1 %v664_v40, %s1685_s20 }
0x1ae1   :  { %v1152_v28 = vpop.permute.xlu0 %1151 }
0x1ae2   :  { %v1154_v43 = vadd.f32 %v1152_v28, %v1144_v27 }
0x1ae4   :  { %1664 = vtanh.f32 %v1154_v43 }
0x1ae9   :  { %v600_v44 = vpop.permute.xlu0 %599 }
0x1aea   :  { %v1665_v46 = vpop.eup %1664  ;;  %603 = vst.msk [vmem:[#allocation3 + $0x18] sm:$0xf] %vm200_vm11, %v600_v44 }
0x1aeb   :  { %1157 = vrot.lane.b32.xlu2 %v1665_v46, %s1684_s19  ;;  %v667_v47 = vpop.permute.xlu1 %666 }
0x1aec   :  { %670 = vst.msk [vmem:[#allocation3 + $0x1c] sm:$0xf] %vm200_vm11, %v667_v47 }
0x1af3   :  { %v1534_v48 = vld [vmem:[#allocation3 + $0x18] sm:$0xff] }
0x1af4   :  { %1472 = vmatmul.msk.bf16.gmra.mxu3 %vm140_vm5, %v1534_v48 }
0x1b45   :  { %v1158_v23 = vpop.permute.xlu2 %1157 }
0x1b46   :  { %v1160_v18 = vmul.f32 %v1158_v23, %v1141_v36 }
0x1b48   :  { %v1161_v51 = vpack.c.bf16 %v1160_v18, %v1160_v18 }
0x1b4a   :  { %v1168_v5 = vunpack.c.l.b16 %v1161_v51 }
0x1b4c   :  { %v1169_v50 = vpack.c.b16 %v1168_v5, %v1168_v5 }
0x1b4e   :  { %1170 = vrot.lane.b32.xlu2 %v1169_v50, %s1685_s20 }
0x1b77   :  { %v755_v53 = vpop.f32.mrf.mxu3 }
0x1b78   :  { %v756_v54 = vadd.f32 %v1902_v41, %v755_v53 }
0x1b7f   :  { %v757_v31 = vpop.f32.mrf.mxu3 }
0x1ba8   :  { %v1171_v52 = vpop.permute.xlu2 %1170 }
0x1ba9   :  { %1492 = vmatmul.msk.bf16.vlgmr.msra.gmra.mxu1 %vm140_vm5, %v1171_v52 }
0x1c26   :  { %v1184_v45 = vpop.f32.mrf.mxu1 }
0x1c27   :  { %v1188_v55 = vadd.f32 %v1184_v45, %v756_v54 }
0x1c29   :  { %1666 = vtanh.f32 %v1188_v55  ;;  %v1493_v59 = vmul.f32 -1.442695, %v1188_v55  ;;  %v1553_v55 = vld [vmem:[%s2085_s8] ss:$0 sm:$0xff] }
0x1c2b   :  { %1668 = vpow2.f32 %v1493_v59 }
0x1c2e   :  { %v1186_v56 = vpop.f32.mrf.mxu1 }
0x1c2f   :  { %v1667_v57 = vpop.eup %1666 }
0x1c30   :  { %1211 = vrot.lane.b32.xlu0 %v1667_v57, %s1684_s19 }
0x1c31   :  { %v1669_v60 = vpop.eup %1668 }
0x1c32   :  { %v1192_v61 = vadd.f32 1.0, %v1669_v60 }
0x1c34   :  { %1670 = vrcp.f32 %v1192_v61  ;;  %v1204_v1 = vand.u32 2147483648, %v1192_v61  ;;  %vm1198_vm1 = vweird.f32 %v1192_v61  ;;  %v1202_v2 = vand.u32 2147483647, %v1192_v61 }
0x1c36   :  { %v1205_v9 = vor.u32 1.1754944e-38, %v1204_v1  ;;  %vm1203_vm3 = vcmp.eq.f32.partialorder %v1202_v2, 8.507059e+37 }
0x1c3a   :  { %v1671_v62 = vpop.eup %1670 }
0x1c3b   :  { %v1194_v49 = vmul.f32 %v1671_v62, %v1192_v61  ;;  %vm1199_vm0 = vweird.f32 %v1671_v62 }
0x1c3c   :  { %vm1200_vm2 = vmor %vm1198_vm1, %vm1199_vm0 }
0x1c3d   :  { %v1195_v7 = vsub.f32 1.0, %v1194_v49 }
0x1c3f   :  { %v1196_v63 = vmul.f32 %v1671_v62, %v1195_v7 }
0x1c41   :  { %v1197_v0 = vadd.f32 %v1671_v62, %v1196_v63 }
0x1c43   :  { %v1201_v3 = vsel %vm1200_vm2, %v1671_v62, %v1197_v0 }
0x1c44   :  { %v1206_v37 = vsel %vm1203_vm3, %v1205_v9, %v1201_v3 }
0x1c45   :  { %v1209_v15 = vmul.f32 %v1206_v37, %v1154_v43 }
0x1ca2   :  { %v1212_v10 = vpop.permute.xlu0 %1211 }
0x1ca3   :  { %v1214_v11 = vmul.f32 %v1212_v10, %v1206_v37 }
0x1ca5   :  { %1216 = vrot.lane.b32.xlu1 %v1214_v11, %s1685_s20 }
0x1d17   :  { %v1217_v24 = vpop.permute.xlu1 %1216 }
0x1d18   :  { %v2008_v16 = vadd.f32 %v1217_v24, %v1209_v15 }
0x1d1a   :  { %1672 = vtanh.f32 %v2008_v16 }
0x1d20   :  { %v1673_v4 = vpop.eup %1672 }
0x1d21   :  { %1222 = vrot.lane.b32.xlu2 %v1673_v4, %s1684_s19 }
0x1d7b   :  { %v1223_v20 = vpop.permute.xlu2 %1222 }
0x1d7c   :  { %v1225_v21 = vmul.f32 %v1223_v20, %v1206_v37 }
0x1d7e   :  { %v1226_v13 = vpack.c.bf16 %v1225_v21, %v1225_v21 }
0x1d80   :  { %v1233_v22 = vunpack.c.l.b16 %v1226_v13 }
0x1d82   :  { %v1234_v19 = vpack.c.b16 %v1233_v22, %v1233_v22 }
0x1d84   :  { %1235 = vrot.lane.b32.xlu0 %v1234_v19, %s1685_s20 }
0x1d8c   :  { %838 = vrot.lane.b32.xlu0 %v1918_v30, %s1685_s20  ;;  %v758_v30 = vadd.f32 %v1902_v41, %v757_v31  ;;  %v1544_v41 = vld [vmem:[%s2084_s7 + $0x8] sm:$0xff] }
0x1d8d   :  { %1363 = vmatpush.bf16.msrb.mxu0 %v1544_v41 }
0x1d94   :  { %968 = vrot.lane.b32.xlu0 %v1950_v39, %s1685_s20 }
0x1d9c   :  { %1163 = vrot.lane.b32.xlu0 %v1161_v51, %s1685_s20 }
0x1df6   :  { %v1236_v25 = vpop.permute.xlu0 %1235 }
0x1df7   :  { %1494 = vmatmul.msk.bf16.vlgmr.msra.gmra.mxu2 %vm140_vm5, %v1236_v25 }
0x1dfe   :  { %v839_v26 = vpop.permute.xlu0 %838 }
0x1dff   :  { %841 = vst.msk [vmem:[#allocation3] sm:$0xf] %vm200_vm11, %v839_v26 }
0x1e06   :  { %v969_v29 = vpop.permute.xlu0 %968 }
0x1e07   :  { %971 = vst.msk [vmem:[#allocation3 + $0x8] sm:$0xf] %vm200_vm11, %v969_v29 }
0x1e0e   :  { %v1164_v6 = vpop.permute.xlu0 %1163 }
0x1e0f   :  { %1166 = vst.msk [vmem:[#allocation3 + $0x14] sm:$0xf] %vm200_vm11, %v1164_v6 }
0x1e7a   :  { %v1249_v14 = vpop.f32.mrf.mxu2 }
0x1e7b   :  { %v1253_v32 = vadd.f32 %v1249_v14, %v758_v30 }
0x1e7d   :  { %1674 = vtanh.f32 %v1253_v32  ;;  %v1495_v34 = vmul.f32 -1.442695, %v1253_v32 }
0x1e7f   :  { %1676 = vpow2.f32 %v1495_v34 }
0x1e82   :  { %v1251_v39 = vpop.f32.mrf.mxu2 }
0x1e83   :  { %v1675_v33 = vpop.eup %1674 }
0x1e84   :  { %1276 = vrot.lane.b32.xlu1 %v1675_v33, %s1684_s19 }
0x1e85   :  { %v1677_v35 = vpop.eup %1676 }
0x1e86   :  { %v1257_v36 = vadd.f32 1.0, %v1677_v35 }
0x1e88   :  { %1678 = vrcp.f32 %v1257_v36  ;;  %v1269_v27 = vand.u32 2147483648, %v1257_v36  ;;  %vm1263_vm6 = vweird.f32 %v1257_v36  ;;  %v1267_v28 = vand.u32 2147483647, %v1257_v36 }
0x1e8a   :  { %v1270_v44 = vor.u32 1.1754944e-38, %v1269_v27  ;;  %vm1268_vm8 = vcmp.eq.f32.partialorder %v1267_v28, 8.507059e+37 }
0x1e8c   :  { %903 = vrot.lane.b32.xlu1 %v1941_v42, %s1685_s20  ;;  %v1543_v42 = vld [vmem:[%s2084_s7] sm:$0xff] }
0x1e8d   :  { %1364 = vmatpush.bf16.msrb.mxu0 %v1543_v42 }
0x1e8e   :  { %v1679_v38 = vpop.eup %1678 }
0x1e8f   :  { %v1259_v8 = vmul.f32 %v1679_v38, %v1257_v36  ;;  %vm1264_vm4 = vweird.f32 %v1679_v38 }
0x1e90   :  { %vm1265_vm7 = vmor %vm1263_vm6, %vm1264_vm4 }
0x1e94   :  { %1033 = vrot.lane.b32.xlu1 %v1966_v12, %s1685_s20  ;;  %v1260_v12 = vsub.f32 1.0, %v1259_v8 }
0x1e96   :  { %v1261_v17 = vmul.f32 %v1679_v38, %v1260_v12 }
0x1e98   :  { %v1262_v40 = vadd.f32 %v1679_v38, %v1261_v17 }
0x1e9a   :  { %v1266_v43 = vsel %vm1265_vm7, %v1679_v38, %v1262_v40 }
0x1e9b   :  { %v1271_v47 = vsel %vm1268_vm8, %v1270_v44, %v1266_v43 }
0x1e9c   :  { %1228 = vrot.lane.b32.xlu1 %v1226_v13, %s1685_s20  ;;  %v1274_v52 = vmul.f32 %v1271_v47, %v2008_v16 }
0x1ef6   :  { %v1277_v46 = vpop.permute.xlu1 %1276 }
0x1ef7   :  { %v1279_v48 = vmul.f32 %v1277_v46, %v1271_v47 }
0x1ef9   :  { %1281 = vrot.lane.b32.xlu2 %v1279_v48, %s1685_s20 }
0x1efe   :  { %v904_v23 = vpop.permute.xlu1 %903 }
0x1eff   :  { %906 = vst.msk [vmem:[#allocation3 + $0x4] sm:$0xf] %vm200_vm11, %v904_v23 }
0x1f06   :  { %v1034_v18 = vpop.permute.xlu1 %1033  ;;  %v1539_v51 = vld [vmem:[#allocation3] sm:$0xff] }
0x1f07   :  { %1036 = vst.msk [vmem:[#allocation3 + $0xc] sm:$0xf] %vm200_vm11, %v1034_v18  ;;  %1520 = vmatmul.msk.bf16.vlgmr.msrb.gmra.mxu0 %vm140_vm5, %v1539_v51 }
0x1f0e   :  { %v1229_v5 = vpop.permute.xlu1 %1228  ;;  %v1540_v50 = vld [vmem:[#allocation3 + $0x8] sm:$0xff] }
0x1f0f   :  { %1231 = vst.msk [vmem:[#allocation3 + $0x18] sm:$0xf] %vm200_vm11, %v1229_v5 }
0x1f17   :  { %1521 = vmatmul.msk.bf16.gmra.mxu0 %vm140_vm5, %v1540_v50 }
0x1f53   :  { %v1282_v53 = vpop.permute.xlu2 %1281 }
0x1f54   :  { %v1284_v54 = vadd.f32 %v1282_v53, %v1274_v52 }
0x1f56   :  { %1680 = vtanh.f32 %v1284_v54 }
0x1f5c   :  { %v1681_v45 = vpop.eup %1680 }
0x1f5d   :  { %1287 = vrot.lane.b32.xlu2 %v1681_v45, %s1684_s19 }
0x1f65   :  { %1098 = vrot.lane.b32.xlu2 %v1984_v58, %s1685_s20 }
0x1f84   :  { %v1366_v56 = vpop.f32.mrf.mxu0 }
0x1f85   :  { %v1367_v57 = vadd.f32 %v1553_v55, %v1366_v56 }
0x1f87   :  { %1386 = vst [vmem:[%s2086_s9] sm:$0xff] %v1367_v57 }
0x1f8c   :  { %v1368_v59 = vpop.f32.mrf.mxu0 }
0x1f8d   :  { %v1369_v60 = vadd.f32 %v1553_v55, %v1368_v59 }
0x1f8f   :  { %1387 = vst [vmem:[%s2086_s9 + $0x8] sm:$0xff] %v1369_v60 }
0x1f94   :  { %v1371_v61 = vpop.f32.mrf.mxu0 }
0x1f95   :  { %v1372_v62 = vadd.f32 %v1553_v55, %v1371_v61 }
0x1f97   :  { %1388 = vst [vmem:[%s2086_s9 + $0x10] sm:$0xff] %v1372_v62 }
0x1f9c   :  { %v1373_v58 = vpop.f32.mrf.mxu0 }
0x1f9d   :  { %v1374_v49 = vadd.f32 %v1553_v55, %v1373_v58 }
0x1f9f   :  { %1389 = vst [vmem:[%s2086_s9 + $0x18] sm:$0xff] %v1374_v49 }
0x1fb7   :  { %v1288_v7 = vpop.permute.xlu2 %1287 }
0x1fb8   :  { %v1290_v63 = vmul.f32 %v1288_v7, %v1271_v47 }
0x1fba   :  { %v1291_v0 = vpack.c.bf16 %v1290_v63, %v1290_v63 }
0x1fbc   :  { %1293 = vrot.lane.b32.xlu2 %v1291_v0, %s1685_s20 }
0x1fbf   :  { %v1099_v1 = vpop.permute.xlu2 %1098 }
0x1fc0   :  { %1101 = vst.msk [vmem:[#allocation3 + $0x10] sm:$0xf] %vm200_vm11, %v1099_v1 }
0x1fc7   :  { %v1541_v2 = vld [vmem:[#allocation3 + $0x10] sm:$0xff] }
0x1fc8   :  { %1522 = vmatmul.msk.bf16.gmra.mxu0 %vm140_vm5, %v1541_v2 }
0x2016   :  { %v1294_v3 = vpop.permute.xlu2 %1293 }
0x2017   :  { %1296 = vst.msk [vmem:[#allocation3 + $0x1c] sm:$0xf] %vm200_vm11, %v1294_v3 }
0x201e   :  { %v1542_v9 = vld [vmem:[#allocation3 + $0x18] sm:$0xff] }
0x201f   :  { %1523 = vmatmul.msk.bf16.gmra.mxu0 %vm140_vm5, %v1542_v9 }
0x2045   :  { %v1376_v10 = vpop.f32.mrf.mxu0 }
0x2046   :  { %v1377_v37 = vadd.f32 %v1553_v55, %v1376_v10 }
0x2048   :  { %1390 = vst [vmem:[%s2086_s9 + $0x20] sm:$0xff] %v1377_v37 }
0x204d   :  { %v1378_v11 = vpop.f32.mrf.mxu0 }
0x204e   :  { %v1379_v15 = vadd.f32 %v1553_v55, %v1378_v11 }
0x2050   :  { %1391 = vst [vmem:[%s2086_s9 + $0x28] sm:$0xff] %v1379_v15 }
0x209c   :  { %v1381_v24 = vpop.f32.mrf.mxu0 }
0x209d   :  { %v1382_v16 = vadd.f32 %v1553_v55, %v1381_v24 }
0x209f   :  { %1392 = vst [vmem:[%s2086_s9 + $0x30] sm:$0xff] %v1382_v16 }
0x20a4   :  { %v1383_v4 = vpop.f32.mrf.mxu0 }
0x20a5   :  { %v1384_v20 = vadd.f32 %v1553_v55, %v1383_v4 }
0x20a7   :  { %1393 = vst [vmem:[%s2086_s9 + $0x38] sm:$0xff] %v1384_v20 }

</bundles_post_ra>
